<compile_context>
chip_gen: v7x
topology: tpu7x:2x2x1
jax: 0.10.0
libtpu: 0.0.40
codegen_flags: <defaults>
</compile_context>

<pallas_src>
import functools

import jax
import jax.numpy as jnp
from jax.experimental import pallas as pl
from jax.experimental.pallas import tpu as pltpu

EXPANSION = 4
BN_EPS = 1e-5


# ------------------------------ Pallas kernel ------------------------------ #

def _bottleneck_kernel(x_ref, mask_ref, w1_ref, b1_ref, w2_ref, b2_ref,
                       w3_ref, b3_ref, *rest, s, Hs, Ws, proj):
    """Fused bottleneck for one image (grid step).

    x_ref   : (1, s*s, PFRA, Cp)  f32   phase-split, spatially padded, flattened rows
    mask_ref: (PFRA, 1)           f32   1.0 on interior rows, 0.0 on spatial-pad rows
    w*_ref  : bf16 weights with BN scale folded in; b*_ref: (1, C) f32 biases
    rest    : [wsc_ref, bsc_ref,] o_ref, h1_scratch
    """
    if proj:
        wsc_ref, bsc_ref, o_ref, h1_scr = rest
    else:
        o_ref, h1_scr = rest

    pitch = Ws + 2                 # padded row length of one phase plane
    outr = Hs * pitch              # output rows (valid cols interleaved with junk)
    mask = mask_ref[...]

    # ---- conv1 (1x1) + bn1 + relu, computed per stride-phase, kept in VMEM ----
    for p in range(s * s):
        xp = x_ref[0, p].astype(jnp.bfloat16)                      # (PFRA, Cp)
        h1 = jnp.dot(xp, w1_ref[...], preferred_element_type=jnp.float32)
        h1 = jnp.maximum(h1 + b1_ref[...], 0.0) * mask             # zero the pad rows
        h1_scr[p] = h1.astype(h1_scr.dtype)

    # ---- conv2 (3x3, stride s, pad 1) + bn2 + relu: 9 accumulating MXU taps ----
    acc = jnp.zeros((outr, w2_ref.shape[-1]), jnp.float32)
    for ky in range(3):
        for kx in range(3):
            qy, py = (ky - 1) // s, (ky - 1) % s
            qx, px = (kx - 1) // s, (kx - 1) % s
            base = (qy + 1) * pitch + (qx + 1)                     # static offset
            slab = h1_scr[py * s + px, pl.ds(base, outr), :]       # contiguous rows
            acc += jnp.dot(slab, w2_ref[ky * 3 + kx],
                           preferred_element_type=jnp.float32)
    h2 = jnp.maximum(acc + b2_ref[...], 0.0).astype(jnp.bfloat16)  # (outr, Pp)

    # ---- shortcut branch (phase (0,0) of x == x[:, ::s, ::s, :]) ----
    res_rows = pl.ds(pitch + 1, outr)
    if proj:
        xs = x_ref[0, 0, res_rows, :].astype(jnp.bfloat16)
        res = jnp.dot(xs, wsc_ref[...], preferred_element_type=jnp.float32)
        res = res + bsc_ref[...]
    else:
        res = x_ref[0, 0, res_rows, :]                             # exact f32 identity

    # ---- conv3 (1x1) + bn3 + residual add + relu ----
    out = jnp.dot(h2, w3_ref[...], preferred_element_type=jnp.float32)
    out = jnp.maximum(out + b3_ref[...] + res, 0.0)
    o_ref[0] = out.astype(o_ref.dtype)


# ------------------------------- wrapper ----------------------------------- #

def _round_up(v, m):
    return ((v + m - 1) // m) * m


def _pad_to(a, shape):
    return jnp.pad(a, [(0, t - s) for s, t in zip(a.shape, shape)])


def fold_bn(gamma, beta, mean, var, eps=BN_EPS):
    scale = gamma / jnp.sqrt(var + eps)
    return scale, beta - mean * scale


def bottleneck_forward(x_nchw, params, stride):
    N, Cin, H, W = x_nchw.shape
    planes = params["conv1_w"].shape[0]
    cout = EXPANSION * planes
    s = int(stride)
    assert H % s == 0 and W % s == 0
    Hs, Ws = H // s, W // s
    ss = s * s
    pitch = Ws + 2
    pfra = _round_up((Hs + 3) * pitch, 8)     # per-phase padded-flat rows
    outr = Hs * pitch                          # output rows (junk cols stripped later)

    Cp = _round_up(Cin, 128)
    Pp = _round_up(planes, 128)
    Cop = _round_up(cout, 128)

    proj = (s != 1) or (Cin != cout)
    if not proj:
        assert Cp == Cop

    # ---- input prep (one pass over x): NCHW->NHWC, stride-phase split, spatial pad
    #      ((1,2),(1,1)) per phase, channel pad to 128, flatten to padded-flat rows.
    #      (In a full network this layout would be carried between blocks instead.)
    x = jnp.transpose(x_nchw, (0, 2, 3, 1)).astype(jnp.float32)          # (N,H,W,C)
    x = x.reshape(N, Hs, s, Ws, s, Cin).transpose(0, 2, 4, 1, 3, 5)      # (N,s,s,Hs,Ws,C)
    x = jnp.pad(x, ((0, 0), (0, 0), (0, 0), (1, 2), (1, 1), (0, Cp - Cin)))
    x_pf = x.reshape(N, ss, (Hs + 3) * pitch, Cp)
    x_pf = jnp.pad(x_pf, ((0, 0), (0, 0), (0, pfra - (Hs + 3) * pitch), (0, 0)))

    # interior-row mask (zeroes conv1 output on the spatial-pad border rows)
    row = jnp.arange(pfra)
    rr, cc = row // pitch, row % pitch
    interior = (rr >= 1) & (rr <= Hs) & (cc >= 1) & (cc <= Ws)
    mask = interior.astype(jnp.float32)[:, None]                          # (pfra, 1)

    # ---- fold BN scale into weights, pad channels, cast weights to bf16 ----
    sc1, b1 = fold_bn(*params["bn1"])
    sc2, b2 = fold_bn(*params["bn2"])
    sc3, b3 = fold_bn(*params["bn3"])
    w1 = _pad_to(params["conv1_w"][:, :, 0, 0].T * sc1[None, :], (Cp, Pp)).astype(jnp.bfloat16)
    w2 = jnp.stack([params["conv2_w"][:, :, ky, kx].T * sc2[None, :]
                    for ky in range(3) for kx in range(3)])               # (9, P, P)
    w2 = _pad_to(w2, (9, Pp, Pp)).astype(jnp.bfloat16)
    w3 = _pad_to(params["conv3_w"][:, :, 0, 0].T * sc3[None, :], (Pp, Cop)).astype(jnp.bfloat16)
    b1p = _pad_to(b1[None, :], (1, Pp))
    b2p = _pad_to(b2[None, :], (1, Pp))
    b3p = _pad_to(b3[None, :], (1, Cop))

    inputs = [x_pf, mask, w1, b1p, w2, b2p, w3, b3p]
    in_specs = [
        pl.BlockSpec((1, ss, pfra, Cp), lambda n: (n, 0, 0, 0)),
        pl.BlockSpec((pfra, 1), lambda n: (0, 0)),
        pl.BlockSpec((Cp, Pp), lambda n: (0, 0)),
        pl.BlockSpec((1, Pp), lambda n: (0, 0)),
        pl.BlockSpec((9, Pp, Pp), lambda n: (0, 0, 0)),
        pl.BlockSpec((1, Pp), lambda n: (0, 0)),
        pl.BlockSpec((Pp, Cop), lambda n: (0, 0)),
        pl.BlockSpec((1, Cop), lambda n: (0, 0)),
    ]
    if proj:
        scsc, bsc = fold_bn(*params["sc_bn"])
        wsc = _pad_to(params["sc_w"][:, :, 0, 0].T * scsc[None, :], (Cp, Cop)).astype(jnp.bfloat16)
        inputs += [wsc, _pad_to(bsc[None, :], (1, Cop))]
        in_specs += [pl.BlockSpec((Cp, Cop), lambda n: (0, 0)),
                     pl.BlockSpec((1, Cop), lambda n: (0, 0))]

    kernel = functools.partial(_bottleneck_kernel, s=s, Hs=Hs, Ws=Ws, proj=proj)

    out = pl.pallas_call(
        kernel,
        out_shape=jax.ShapeDtypeStruct((N, outr, Cop), jnp.float32),
        grid=(N,),
        in_specs=in_specs,
        out_specs=pl.BlockSpec((1, outr, Cop), lambda n: (n, 0, 0)),
        scratch_shapes=[pltpu.VMEM((ss, pfra, Pp), jnp.bfloat16)],
        compiler_params=pltpu.CompilerParams(
            dimension_semantics=("parallel",)),
    )(*inputs)

    # strip the junk columns / padded channels and return NCHW
    out = out.reshape(N, Hs, pitch, Cop)[:, :, :Ws, :cout]
    return jnp.transpose(out, (0, 3, 1, 2))


# --------------------------- reference (pure JAX) --------------------------- #

def _ref_conv(x_nhwc, w_oihw, stride, pad):
    w_hwio = jnp.transpose(w_oihw, (2, 3, 1, 0))
    return jax.lax.conv_general_dilated(
        x_nhwc, w_hwio, window_strides=(stride, stride),
        padding=((pad, pad), (pad, pad)),
        dimension_numbers=("NHWC", "HWIO", "NHWC"))


def bottleneck_reference(x_nchw, params, stride):
    x = jnp.transpose(x_nchw, (0, 2, 3, 1)).astype(jnp.float32)
    planes = params["conv1_w"].shape[0]
    cout = EXPANSION * planes
    Cin = x.shape[-1]

    def bn(h, p):
        sc, b = fold_bn(*p)
        return h * sc + b

    h = jax.nn.relu(bn(_ref_conv(x, params["conv1_w"], 1, 0), params["bn1"]))
    h = jax.nn.relu(bn(_ref_conv(h, params["conv2_w"], stride, 1), params["bn2"]))
    h = bn(_ref_conv(h, params["conv3_w"], 1, 0), params["bn3"])
    if stride != 1 or Cin != cout:
        r = bn(_ref_conv(x, params["sc_w"], stride, 0), params["sc_bn"])
    else:
        r = x
    out = jax.nn.relu(h + r)
    return jnp.transpose(out, (0, 3, 1, 2))


# ---------------------------------- main ------------------------------------ #

def init_params(key, in_planes, planes, stride):
    cout = EXPANSION * planes
    ks = jax.random.split(key, 12)

    def bn_params(kk, c):
        k1, k2, k3 = jax.random.split(kk, 3)
        gamma = 1.0 + 0.1 * jax.random.normal(k1, (c,), jnp.float32)
        beta = 0.1 * jax.random.normal(k2, (c,), jnp.float32)
        mean = 0.1 * jax.random.normal(k3, (c,), jnp.float32)
        var = jnp.ones((c,), jnp.float32)
        return (gamma, beta, mean, var)

    params = {
        "conv1_w": 0.1 * jax.random.normal(ks[0], (planes, in_planes, 1, 1), jnp.float32),
        "bn1": bn_params(ks[1], planes),
        "conv2_w": 0.1 * jax.random.normal(ks[2], (planes, planes, 3, 3), jnp.float32),
        "bn2": bn_params(ks[3], planes),
        "conv3_w": 0.1 * jax.random.normal(ks[4], (cout, planes, 1, 1), jnp.float32),
        "bn3": bn_params(ks[5], cout),
    }
    if stride != 1 or in_planes != cout:
        params["sc_w"] = 0.1 * jax.random.normal(ks[6], (cout, in_planes, 1, 1), jnp.float32)
        params["sc_bn"] = bn_params(ks[7], cout)
    return params


if __name__ == "__main__":
    key = jax.random.PRNGKey(0)
    k_x, k_p, k_x2, k_p2 = jax.random.split(key, 4)

    # config 1: projection shortcut path (stride 2)
    N, in_planes, H, W = 2, 16, 8, 8
    planes, stride = 8, 2
    x = jax.random.normal(k_x, (N, in_planes, H, W), jnp.float32)
    params = init_params(k_p, in_planes, planes, stride)
    out = jax.block_until_ready(bottleneck_forward(x, params, stride))
    ref = jax.block_until_ready(bottleneck_reference(x, params, stride))
    assert out.shape == (N, EXPANSION * planes, H // stride, W // stride), out.shape
    err = float(jnp.max(jnp.abs(out - ref)))
    assert jnp.allclose(out, ref, rtol=2e-2, atol=2e-2), err   # bf16 MXU operands

    # config 2: identity shortcut path (stride 1, in_planes == expansion*planes)
    in_planes2, planes2, stride2 = 32, 8, 1
    x2 = jax.random.normal(k_x2, (N, in_planes2, H, W), jnp.float32)
    params2 = init_params(k_p2, in_planes2, planes2, stride2)
    out2 = jax.block_until_ready(bottleneck_forward(x2, params2, stride2))
    ref2 = jax.block_until_ready(bottleneck_reference(x2, params2, stride2))
    assert out2.shape == (N, EXPANSION * planes2, H, W), out2.shape
    err2 = float(jnp.max(jnp.abs(out2 - ref2)))
    assert jnp.allclose(out2, ref2, rtol=2e-2, atol=2e-2), err2

    print("KERNEL_OK")
</pallas_src>

<mosaic_0001>
module attributes {stable_mosaic.version = 11 : i64} {
  func.func @_bottleneck_kernel(%arg0: i32, %arg1: memref<1x4x48x128xf32, #tpu.memory_space<vmem>>, %arg2: memref<48x1xf32, #tpu.memory_space<vmem>>, %arg3: memref<128x128xbf16, #tpu.memory_space<vmem>>, %arg4: memref<1x128xf32, #tpu.memory_space<vmem>>, %arg5: memref<9x128x128xbf16, #tpu.memory_space<vmem>>, %arg6: memref<1x128xf32, #tpu.memory_space<vmem>>, %arg7: memref<128x128xbf16, #tpu.memory_space<vmem>>, %arg8: memref<1x128xf32, #tpu.memory_space<vmem>>, %arg9: memref<128x128xbf16, #tpu.memory_space<vmem>>, %arg10: memref<1x128xf32, #tpu.memory_space<vmem>>, %arg11: memref<1x24x128xf32, #tpu.memory_space<vmem>>, %arg12: memref<4x48x128xbf16, #tpu.memory_space<vmem>>) attributes {dimension_semantics = [#tpu.dimension_semantics<parallel>], iteration_bounds = array<i64: 2>, scalar_prefetch = 0 : i64, scratch_operands = 1 : i64, tpu.core_type = #tpu.core_type<tc>, window_params = [{transform_indices = @transform_0, window_bounds = array<i64: 1, 4, 48, 128>}, {pipeline_mode = #tpu.pipeline_mode<synchronous>, transform_indices = @transform_1, window_bounds = array<i64: 48, 1>}, {pipeline_mode = #tpu.pipeline_mode<synchronous>, transform_indices = @transform_2, window_bounds = array<i64: 128, 128>}, {pipeline_mode = #tpu.pipeline_mode<synchronous>, transform_indices = @transform_3, window_bounds = array<i64: 1, 128>}, {pipeline_mode = #tpu.pipeline_mode<synchronous>, transform_indices = @transform_4, window_bounds = array<i64: 9, 128, 128>}, {pipeline_mode = #tpu.pipeline_mode<synchronous>, transform_indices = @transform_5, window_bounds = array<i64: 1, 128>}, {pipeline_mode = #tpu.pipeline_mode<synchronous>, transform_indices = @transform_6, window_bounds = array<i64: 128, 128>}, {pipeline_mode = #tpu.pipeline_mode<synchronous>, transform_indices = @transform_7, window_bounds = array<i64: 1, 128>}, {pipeline_mode = #tpu.pipeline_mode<synchronous>, transform_indices = @transform_8, window_bounds = array<i64: 128, 128>}, {pipeline_mode = #tpu.pipeline_mode<synchronous>, transform_indices = @transform_9, window_bounds = array<i64: 1, 128>}, {transform_indices = @transform_10, window_bounds = array<i64: 1, 24, 128>}]} {
    %c0 = arith.constant 0 : index
    %c0_0 = arith.constant 0 : index
    %0 = vector.load %arg2[%c0, %c0_0] : memref<48x1xf32, #tpu.memory_space<vmem>>, vector<48x1xf32>
    %c0_1 = arith.constant 0 : index
    %c0_2 = arith.constant 0 : index
    %c0_3 = arith.constant 0 : index
    %c0_4 = arith.constant 0 : index
    %1 = vector.load %arg1[%c0_1, %c0_2, %c0_3, %c0_4] : memref<1x4x48x128xf32, #tpu.memory_space<vmem>>, vector<1x1x48x128xf32>
    %2 = vector.shape_cast %1 : vector<1x1x48x128xf32> to vector<48x128xf32>
    %3 = arith.truncf %2 : vector<48x128xf32> to vector<48x128xbf16>
    %c0_5 = arith.constant 0 : index
    %c0_6 = arith.constant 0 : index
    %4 = vector.load %arg3[%c0_5, %c0_6] : memref<128x128xbf16, #tpu.memory_space<vmem>>, vector<128x128xbf16>
    %cst = arith.constant dense<0.000000e+00> : vector<48x128xf32>
    %5 = tpu.matmul %3, %4, %cst {dimension_numbers = #tpu.dot_dimension_numbers<[1], [0], [0], [1], [0, 0, 1, 1], [], []>} : vector<48x128xbf16>, vector<128x128xbf16>, vector<48x128xf32> -> vector<48x128xf32>
    %c0_7 = arith.constant 0 : index
    %c0_8 = arith.constant 0 : index
    %6 = vector.load %arg4[%c0_7, %c0_8] : memref<1x128xf32, #tpu.memory_space<vmem>>, vector<1x128xf32>
    %7 = vector.broadcast %6 : vector<1x128xf32> to vector<48x128xf32>
    %8 = arith.addf %5, %7 : vector<48x128xf32>
    %cst_9 = arith.constant 0.000000e+00 : f32
    %9 = vector.broadcast %cst_9 : f32 to vector<48x128xf32>
    %10 = arith.maximumf %8, %9 : vector<48x128xf32>
    %11 = vector.broadcast %0 : vector<48x1xf32> to vector<48x128xf32>
    %12 = arith.mulf %10, %11 : vector<48x128xf32>
    %13 = arith.truncf %12 : vector<48x128xf32> to vector<48x128xbf16>
    %c0_10 = arith.constant 0 : index
    %c0_11 = arith.constant 0 : index
    %c0_12 = arith.constant 0 : index
    %14 = vector.load %arg12[%c0_10, %c0_11, %c0_12] : memref<4x48x128xbf16, #tpu.memory_space<vmem>>, vector<1x48x128xbf16>
    %15 = vector.shape_cast %14 : vector<1x48x128xbf16> to vector<48x128xbf16>
    %16 = vector.shape_cast %13 : vector<48x128xbf16> to vector<1x48x128xbf16>
    tpu.vector_store %arg12[%c0_10, %c0_11, %c0_12], %16 {strides = array<i32>} : memref<4x48x128xbf16, #tpu.memory_space<vmem>>, vector<1x48x128xbf16>,
    %c0_13 = arith.constant 0 : index
    %c1 = arith.constant 1 : index
    %c0_14 = arith.constant 0 : index
    %c0_15 = arith.constant 0 : index
    %17 = vector.load %arg1[%c0_13, %c1, %c0_14, %c0_15] : memref<1x4x48x128xf32, #tpu.memory_space<vmem>>, vector<1x1x48x128xf32>
    %18 = vector.shape_cast %17 : vector<1x1x48x128xf32> to vector<48x128xf32>
    %19 = arith.truncf %18 : vector<48x128xf32> to vector<48x128xbf16>
    %c0_16 = arith.constant 0 : index
    %c0_17 = arith.constant 0 : index
    %20 = vector.load %arg3[%c0_16, %c0_17] : memref<128x128xbf16, #tpu.memory_space<vmem>>, vector<128x128xbf16>
    %cst_18 = arith.constant dense<0.000000e+00> : vector<48x128xf32>
    %21 = tpu.matmul %19, %20, %cst_18 {dimension_numbers = #tpu.dot_dimension_numbers<[1], [0], [0], [1], [0, 0, 1, 1], [], []>} : vector<48x128xbf16>, vector<128x128xbf16>, vector<48x128xf32> -> vector<48x128xf32>
    %c0_19 = arith.constant 0 : index
    %c0_20 = arith.constant 0 : index
    %22 = vector.load %arg4[%c0_19, %c0_20] : memref<1x128xf32, #tpu.memory_space<vmem>>, vector<1x128xf32>
    %23 = vector.broadcast %22 : vector<1x128xf32> to vector<48x128xf32>
    %24 = arith.addf %21, %23 : vector<48x128xf32>
    %cst_21 = arith.constant 0.000000e+00 : f32
    %25 = vector.broadcast %cst_21 : f32 to vector<48x128xf32>
    %26 = arith.maximumf %24, %25 : vector<48x128xf32>
    %27 = vector.broadcast %0 : vector<48x1xf32> to vector<48x128xf32>
    %28 = arith.mulf %26, %27 : vector<48x128xf32>
    %29 = arith.truncf %28 : vector<48x128xf32> to vector<48x128xbf16>
    %c1_22 = arith.constant 1 : index
    %c0_23 = arith.constant 0 : index
    %c0_24 = arith.constant 0 : index
    %30 = vector.load %arg12[%c1_22, %c0_23, %c0_24] : memref<4x48x128xbf16, #tpu.memory_space<vmem>>, vector<1x48x128xbf16>
    %31 = vector.shape_cast %30 : vector<1x48x128xbf16> to vector<48x128xbf16>
    %32 = vector.shape_cast %29 : vector<48x128xbf16> to vector<1x48x128xbf16>
    tpu.vector_store %arg12[%c1_22, %c0_23, %c0_24], %32 {strides = array<i32>} : memref<4x48x128xbf16, #tpu.memory_space<vmem>>, vector<1x48x128xbf16>,
    %c0_25 = arith.constant 0 : index
    %c2 = arith.constant 2 : index
    %c0_26 = arith.constant 0 : index
    %c0_27 = arith.constant 0 : index
    %33 = vector.load %arg1[%c0_25, %c2, %c0_26, %c0_27] : memref<1x4x48x128xf32, #tpu.memory_space<vmem>>, vector<1x1x48x128xf32>
    %34 = vector.shape_cast %33 : vector<1x1x48x128xf32> to vector<48x128xf32>
    %35 = arith.truncf %34 : vector<48x128xf32> to vector<48x128xbf16>
    %c0_28 = arith.constant 0 : index
    %c0_29 = arith.constant 0 : index
    %36 = vector.load %arg3[%c0_28, %c0_29] : memref<128x128xbf16, #tpu.memory_space<vmem>>, vector<128x128xbf16>
    %cst_30 = arith.constant dense<0.000000e+00> : vector<48x128xf32>
    %37 = tpu.matmul %35, %36, %cst_30 {dimension_numbers = #tpu.dot_dimension_numbers<[1], [0], [0], [1], [0, 0, 1, 1], [], []>} : vector<48x128xbf16>, vector<128x128xbf16>, vector<48x128xf32> -> vector<48x128xf32>
    %c0_31 = arith.constant 0 : index
    %c0_32 = arith.constant 0 : index
    %38 = vector.load %arg4[%c0_31, %c0_32] : memref<1x128xf32, #tpu.memory_space<vmem>>, vector<1x128xf32>
    %39 = vector.broadcast %38 : vector<1x128xf32> to vector<48x128xf32>
    %40 = arith.addf %37, %39 : vector<48x128xf32>
    %cst_33 = arith.constant 0.000000e+00 : f32
    %41 = vector.broadcast %cst_33 : f32 to vector<48x128xf32>
    %42 = arith.maximumf %40, %41 : vector<48x128xf32>
    %43 = vector.broadcast %0 : vector<48x1xf32> to vector<48x128xf32>
    %44 = arith.mulf %42, %43 : vector<48x128xf32>
    %45 = arith.truncf %44 : vector<48x128xf32> to vector<48x128xbf16>
    %c2_34 = arith.constant 2 : index
    %c0_35 = arith.constant 0 : index
    %c0_36 = arith.constant 0 : index
    %46 = vector.load %arg12[%c2_34, %c0_35, %c0_36] : memref<4x48x128xbf16, #tpu.memory_space<vmem>>, vector<1x48x128xbf16>
    %47 = vector.shape_cast %46 : vector<1x48x128xbf16> to vector<48x128xbf16>
    %48 = vector.shape_cast %45 : vector<48x128xbf16> to vector<1x48x128xbf16>
    tpu.vector_store %arg12[%c2_34, %c0_35, %c0_36], %48 {strides = array<i32>} : memref<4x48x128xbf16, #tpu.memory_space<vmem>>, vector<1x48x128xbf16>,
    %c0_37 = arith.constant 0 : index
    %c3 = arith.constant 3 : index
    %c0_38 = arith.constant 0 : index
    %c0_39 = arith.constant 0 : index
    %49 = vector.load %arg1[%c0_37, %c3, %c0_38, %c0_39] : memref<1x4x48x128xf32, #tpu.memory_space<vmem>>, vector<1x1x48x128xf32>
    %50 = vector.shape_cast %49 : vector<1x1x48x128xf32> to vector<48x128xf32>
    %51 = arith.truncf %50 : vector<48x128xf32> to vector<48x128xbf16>
    %c0_40 = arith.constant 0 : index
    %c0_41 = arith.constant 0 : index
    %52 = vector.load %arg3[%c0_40, %c0_41] : memref<128x128xbf16, #tpu.memory_space<vmem>>, vector<128x128xbf16>
    %cst_42 = arith.constant dense<0.000000e+00> : vector<48x128xf32>
    %53 = tpu.matmul %51, %52, %cst_42 {dimension_numbers = #tpu.dot_dimension_numbers<[1], [0], [0], [1], [0, 0, 1, 1], [], []>} : vector<48x128xbf16>, vector<128x128xbf16>, vector<48x128xf32> -> vector<48x128xf32>
    %c0_43 = arith.constant 0 : index
    %c0_44 = arith.constant 0 : index
    %54 = vector.load %arg4[%c0_43, %c0_44] : memref<1x128xf32, #tpu.memory_space<vmem>>, vector<1x128xf32>
    %55 = vector.broadcast %54 : vector<1x128xf32> to vector<48x128xf32>
    %56 = arith.addf %53, %55 : vector<48x128xf32>
    %cst_45 = arith.constant 0.000000e+00 : f32
    %57 = vector.broadcast %cst_45 : f32 to vector<48x128xf32>
    %58 = arith.maximumf %56, %57 : vector<48x128xf32>
    %59 = vector.broadcast %0 : vector<48x1xf32> to vector<48x128xf32>
    %60 = arith.mulf %58, %59 : vector<48x128xf32>
    %61 = arith.truncf %60 : vector<48x128xf32> to vector<48x128xbf16>
    %c3_46 = arith.constant 3 : index
    %c0_47 = arith.constant 0 : index
    %c0_48 = arith.constant 0 : index
    %62 = vector.load %arg12[%c3_46, %c0_47, %c0_48] : memref<4x48x128xbf16, #tpu.memory_space<vmem>>, vector<1x48x128xbf16>
    %63 = vector.shape_cast %62 : vector<1x48x128xbf16> to vector<48x128xbf16>
    %64 = vector.shape_cast %61 : vector<48x128xbf16> to vector<1x48x128xbf16>
    tpu.vector_store %arg12[%c3_46, %c0_47, %c0_48], %64 {strides = array<i32>} : memref<4x48x128xbf16, #tpu.memory_space<vmem>>, vector<1x48x128xbf16>,
    %cst_49 = arith.constant 0.000000e+00 : f32
    %65 = vector.broadcast %cst_49 : f32 to vector<24x128xf32>
    %c3_50 = arith.constant 3 : index
    %c0_51 = arith.constant 0 : index
    %c0_52 = arith.constant 0 : index
    %66 = vector.load %arg12[%c3_50, %c0_51, %c0_52] : memref<4x48x128xbf16, #tpu.memory_space<vmem>>, vector<1x24x128xbf16>
    %67 = vector.shape_cast %66 : vector<1x24x128xbf16> to vector<24x128xbf16>
    %c0_53 = arith.constant 0 : index
    %c0_54 = arith.constant 0 : index
    %c0_55 = arith.constant 0 : index
    %68 = vector.load %arg5[%c0_53, %c0_54, %c0_55] : memref<9x128x128xbf16, #tpu.memory_space<vmem>>, vector<1x128x128xbf16>
    %69 = vector.shape_cast %68 : vector<1x128x128xbf16> to vector<128x128xbf16>
    %cst_56 = arith.constant dense<0.000000e+00> : vector<24x128xf32>
    %70 = tpu.matmul %67, %69, %cst_56 {dimension_numbers = #tpu.dot_dimension_numbers<[1], [0], [0], [1], [0, 0, 1, 1], [], []>} : vector<24x128xbf16>, vector<128x128xbf16>, vector<24x128xf32> -> vector<24x128xf32>
    %71 = arith.addf %65, %70 : vector<24x128xf32>
    %c2_57 = arith.constant 2 : index
    %c1_58 = arith.constant 1 : index
    %c0_59 = arith.constant 0 : index
    %72 = vector.load %arg12[%c2_57, %c1_58, %c0_59] : memref<4x48x128xbf16, #tpu.memory_space<vmem>>, vector<1x24x128xbf16>
    %73 = vector.shape_cast %72 : vector<1x24x128xbf16> to vector<24x128xbf16>
    %c1_60 = arith.constant 1 : index
    %c0_61 = arith.constant 0 : index
    %c0_62 = arith.constant 0 : index
    %74 = vector.load %arg5[%c1_60, %c0_61, %c0_62] : memref<9x128x128xbf16, #tpu.memory_space<vmem>>, vector<1x128x128xbf16>
    %75 = vector.shape_cast %74 : vector<1x128x128xbf16> to vector<128x128xbf16>
    %cst_63 = arith.constant dense<0.000000e+00> : vector<24x128xf32>
    %76 = tpu.matmul %73, %75, %cst_63 {dimension_numbers = #tpu.dot_dimension_numbers<[1], [0], [0], [1], [0, 0, 1, 1], [], []>} : vector<24x128xbf16>, vector<128x128xbf16>, vector<24x128xf32> -> vector<24x128xf32>
    %77 = arith.addf %71, %76 : vector<24x128xf32>
    %c3_64 = arith.constant 3 : index
    %c1_65 = arith.constant 1 : index
    %c0_66 = arith.constant 0 : index
    %78 = vector.load %arg12[%c3_64, %c1_65, %c0_66] : memref<4x48x128xbf16, #tpu.memory_space<vmem>>, vector<1x24x128xbf16>
    %79 = vector.shape_cast %78 : vector<1x24x128xbf16> to vector<24x128xbf16>
    %c2_67 = arith.constant 2 : index
    %c0_68 = arith.constant 0 : index
    %c0_69 = arith.constant 0 : index
    %80 = vector.load %arg5[%c2_67, %c0_68, %c0_69] : memref<9x128x128xbf16, #tpu.memory_space<vmem>>, vector<1x128x128xbf16>
    %81 = vector.shape_cast %80 : vector<1x128x128xbf16> to vector<128x128xbf16>
    %cst_70 = arith.constant dense<0.000000e+00> : vector<24x128xf32>
    %82 = tpu.matmul %79, %81, %cst_70 {dimension_numbers = #tpu.dot_dimension_numbers<[1], [0], [0], [1], [0, 0, 1, 1], [], []>} : vector<24x128xbf16>, vector<128x128xbf16>, vector<24x128xf32> -> vector<24x128xf32>
    %83 = arith.addf %77, %82 : vector<24x128xf32>
    %c1_71 = arith.constant 1 : index
    %c6 = arith.constant 6 : index
    %c0_72 = arith.constant 0 : index
    %84 = vector.load %arg12[%c1_71, %c6, %c0_72] : memref<4x48x128xbf16, #tpu.memory_space<vmem>>, vector<1x24x128xbf16>
    %85 = vector.shape_cast %84 : vector<1x24x128xbf16> to vector<24x128xbf16>
    %c3_73 = arith.constant 3 : index
    %c0_74 = arith.constant 0 : index
    %c0_75 = arith.constant 0 : index
    %86 = vector.load %arg5[%c3_73, %c0_74, %c0_75] : memref<9x128x128xbf16, #tpu.memory_space<vmem>>, vector<1x128x128xbf16>
    %87 = vector.shape_cast %86 : vector<1x128x128xbf16> to vector<128x128xbf16>
    %cst_76 = arith.constant dense<0.000000e+00> : vector<24x128xf32>
    %88 = tpu.matmul %85, %87, %cst_76 {dimension_numbers = #tpu.dot_dimension_numbers<[1], [0], [0], [1], [0, 0, 1, 1], [], []>} : vector<24x128xbf16>, vector<128x128xbf16>, vector<24x128xf32> -> vector<24x128xf32>
    %89 = arith.addf %83, %88 : vector<24x128xf32>
    %c0_77 = arith.constant 0 : index
    %c7 = arith.constant 7 : index
    %c0_78 = arith.constant 0 : index
    %90 = vector.load %arg12[%c0_77, %c7, %c0_78] : memref<4x48x128xbf16, #tpu.memory_space<vmem>>, vector<1x24x128xbf16>
    %91 = vector.shape_cast %90 : vector<1x24x128xbf16> to vector<24x128xbf16>
    %c4 = arith.constant 4 : index
    %c0_79 = arith.constant 0 : index
    %c0_80 = arith.constant 0 : index
    %92 = vector.load %arg5[%c4, %c0_79, %c0_80] : memref<9x128x128xbf16, #tpu.memory_space<vmem>>, vector<1x128x128xbf16>
    %93 = vector.shape_cast %92 : vector<1x128x128xbf16> to vector<128x128xbf16>
    %cst_81 = arith.constant dense<0.000000e+00> : vector<24x128xf32>
    %94 = tpu.matmul %91, %93, %cst_81 {dimension_numbers = #tpu.dot_dimension_numbers<[1], [0], [0], [1], [0, 0, 1, 1], [], []>} : vector<24x128xbf16>, vector<128x128xbf16>, vector<24x128xf32> -> vector<24x128xf32>
    %95 = arith.addf %89, %94 : vector<24x128xf32>
    %c1_82 = arith.constant 1 : index
    %c7_83 = arith.constant 7 : index
    %c0_84 = arith.constant 0 : index
    %96 = vector.load %arg12[%c1_82, %c7_83, %c0_84] : memref<4x48x128xbf16, #tpu.memory_space<vmem>>, vector<1x24x128xbf16>
    %97 = vector.shape_cast %96 : vector<1x24x128xbf16> to vector<24x128xbf16>
    %c5 = arith.constant 5 : index
    %c0_85 = arith.constant 0 : index
    %c0_86 = arith.constant 0 : index
    %98 = vector.load %arg5[%c5, %c0_85, %c0_86] : memref<9x128x128xbf16, #tpu.memory_space<vmem>>, vector<1x128x128xbf16>
    %99 = vector.shape_cast %98 : vector<1x128x128xbf16> to vector<128x128xbf16>
    %cst_87 = arith.constant dense<0.000000e+00> : vector<24x128xf32>
    %100 = tpu.matmul %97, %99, %cst_87 {dimension_numbers = #tpu.dot_dimension_numbers<[1], [0], [0], [1], [0, 0, 1, 1], [], []>} : vector<24x128xbf16>, vector<128x128xbf16>, vector<24x128xf32> -> vector<24x128xf32>
    %101 = arith.addf %95, %100 : vector<24x128xf32>
    %c3_88 = arith.constant 3 : index
    %c6_89 = arith.constant 6 : index
    %c0_90 = arith.constant 0 : index
    %102 = vector.load %arg12[%c3_88, %c6_89, %c0_90] : memref<4x48x128xbf16, #tpu.memory_space<vmem>>, vector<1x24x128xbf16>
    %103 = vector.shape_cast %102 : vector<1x24x128xbf16> to vector<24x128xbf16>
    %c6_91 = arith.constant 6 : index
    %c0_92 = arith.constant 0 : index
    %c0_93 = arith.constant 0 : index
    %104 = vector.load %arg5[%c6_91, %c0_92, %c0_93] : memref<9x128x128xbf16, #tpu.memory_space<vmem>>, vector<1x128x128xbf16>
    %105 = vector.shape_cast %104 : vector<1x128x128xbf16> to vector<128x128xbf16>
    %cst_94 = arith.constant dense<0.000000e+00> : vector<24x128xf32>
    %106 = tpu.matmul %103, %105, %cst_94 {dimension_numbers = #tpu.dot_dimension_numbers<[1], [0], [0], [1], [0, 0, 1, 1], [], []>} : vector<24x128xbf16>, vector<128x128xbf16>, vector<24x128xf32> -> vector<24x128xf32>
    %107 = arith.addf %101, %106 : vector<24x128xf32>
    %c2_95 = arith.constant 2 : index
    %c7_96 = arith.constant 7 : index
    %c0_97 = arith.constant 0 : index
    %108 = vector.load %arg12[%c2_95, %c7_96, %c0_97] : memref<4x48x128xbf16, #tpu.memory_space<vmem>>, vector<1x24x128xbf16>
    %109 = vector.shape_cast %108 : vector<1x24x128xbf16> to vector<24x128xbf16>
    %c7_98 = arith.constant 7 : index
    %c0_99 = arith.constant 0 : index
    %c0_100 = arith.constant 0 : index
    %110 = vector.load %arg5[%c7_98, %c0_99, %c0_100] : memref<9x128x128xbf16, #tpu.memory_space<vmem>>, vector<1x128x128xbf16>
    %111 = vector.shape_cast %110 : vector<1x128x128xbf16> to vector<128x128xbf16>
    %cst_101 = arith.constant dense<0.000000e+00> : vector<24x128xf32>
    %112 = tpu.matmul %109, %111, %cst_101 {dimension_numbers = #tpu.dot_dimension_numbers<[1], [0], [0], [1], [0, 0, 1, 1], [], []>} : vector<24x128xbf16>, vector<128x128xbf16>, vector<24x128xf32> -> vector<24x128xf32>
    %113 = arith.addf %107, %112 : vector<24x128xf32>
    %c3_102 = arith.constant 3 : index
    %c7_103 = arith.constant 7 : index
    %c0_104 = arith.constant 0 : index
    %114 = vector.load %arg12[%c3_102, %c7_103, %c0_104] : memref<4x48x128xbf16, #tpu.memory_space<vmem>>, vector<1x24x128xbf16>
    %115 = vector.shape_cast %114 : vector<1x24x128xbf16> to vector<24x128xbf16>
    %c8 = arith.constant 8 : index
    %c0_105 = arith.constant 0 : index
    %c0_106 = arith.constant 0 : index
    %116 = vector.load %arg5[%c8, %c0_105, %c0_106] : memref<9x128x128xbf16, #tpu.memory_space<vmem>>, vector<1x128x128xbf16>
    %117 = vector.shape_cast %116 : vector<1x128x128xbf16> to vector<128x128xbf16>
    %cst_107 = arith.constant dense<0.000000e+00> : vector<24x128xf32>
    %118 = tpu.matmul %115, %117, %cst_107 {dimension_numbers = #tpu.dot_dimension_numbers<[1], [0], [0], [1], [0, 0, 1, 1], [], []>} : vector<24x128xbf16>, vector<128x128xbf16>, vector<24x128xf32> -> vector<24x128xf32>
    %119 = arith.addf %113, %118 : vector<24x128xf32>
    %c0_108 = arith.constant 0 : index
    %c0_109 = arith.constant 0 : index
    %120 = vector.load %arg6[%c0_108, %c0_109] : memref<1x128xf32, #tpu.memory_space<vmem>>, vector<1x128xf32>
    %121 = vector.broadcast %120 : vector<1x128xf32> to vector<24x128xf32>
    %122 = arith.addf %119, %121 : vector<24x128xf32>
    %cst_110 = arith.constant 0.000000e+00 : f32
    %123 = vector.broadcast %cst_110 : f32 to vector<24x128xf32>
    %124 = arith.maximumf %122, %123 : vector<24x128xf32>
    %125 = arith.truncf %124 : vector<24x128xf32> to vector<24x128xbf16>
    %c0_111 = arith.constant 0 : index
    %c0_112 = arith.constant 0 : index
    %c7_113 = arith.constant 7 : index
    %c0_114 = arith.constant 0 : index
    %126 = vector.load %arg1[%c0_111, %c0_112, %c7_113, %c0_114] : memref<1x4x48x128xf32, #tpu.memory_space<vmem>>, vector<1x1x24x128xf32>
    %127 = vector.shape_cast %126 : vector<1x1x24x128xf32> to vector<24x128xf32>
    %128 = arith.truncf %127 : vector<24x128xf32> to vector<24x128xbf16>
    %c0_115 = arith.constant 0 : index
    %c0_116 = arith.constant 0 : index
    %129 = vector.load %arg9[%c0_115, %c0_116] : memref<128x128xbf16, #tpu.memory_space<vmem>>, vector<128x128xbf16>
    %cst_117 = arith.constant dense<0.000000e+00> : vector<24x128xf32>
    %130 = tpu.matmul %128, %129, %cst_117 {dimension_numbers = #tpu.dot_dimension_numbers<[1], [0], [0], [1], [0, 0, 1, 1], [], []>} : vector<24x128xbf16>, vector<128x128xbf16>, vector<24x128xf32> -> vector<24x128xf32>
    %c0_118 = arith.constant 0 : index
    %c0_119 = arith.constant 0 : index
    %131 = vector.load %arg10[%c0_118, %c0_119] : memref<1x128xf32, #tpu.memory_space<vmem>>, vector<1x128xf32>
    %132 = vector.broadcast %131 : vector<1x128xf32> to vector<24x128xf32>
    %133 = arith.addf %130, %132 : vector<24x128xf32>
    %c0_120 = arith.constant 0 : index
    %c0_121 = arith.constant 0 : index
    %134 = vector.load %arg7[%c0_120, %c0_121] : memref<128x128xbf16, #tpu.memory_space<vmem>>, vector<128x128xbf16>
    %cst_122 = arith.constant dense<0.000000e+00> : vector<24x128xf32>
    %135 = tpu.matmul %125, %134, %cst_122 {dimension_numbers = #tpu.dot_dimension_numbers<[1], [0], [0], [1], [0, 0, 1, 1], [], []>} : vector<24x128xbf16>, vector<128x128xbf16>, vector<24x128xf32> -> vector<24x128xf32>
    %c0_123 = arith.constant 0 : index
    %c0_124 = arith.constant 0 : index
    %136 = vector.load %arg8[%c0_123, %c0_124] : memref<1x128xf32, #tpu.memory_space<vmem>>, vector<1x128xf32>
    %137 = vector.broadcast %136 : vector<1x128xf32> to vector<24x128xf32>
    %138 = arith.addf %135, %137 : vector<24x128xf32>
    %139 = arith.addf %138, %133 : vector<24x128xf32>
    %cst_125 = arith.constant 0.000000e+00 : f32
    %140 = vector.broadcast %cst_125 : f32 to vector<24x128xf32>
    %141 = arith.maximumf %139, %140 : vector<24x128xf32>
    %c0_126 = arith.constant 0 : index
    %c0_127 = arith.constant 0 : index
    %c0_128 = arith.constant 0 : index
    %142 = vector.load %arg11[%c0_126, %c0_127, %c0_128] : memref<1x24x128xf32, #tpu.memory_space<vmem>>, vector<1x24x128xf32>
    %143 = vector.shape_cast %142 : vector<1x24x128xf32> to vector<24x128xf32>
    %144 = vector.shape_cast %141 : vector<24x128xf32> to vector<1x24x128xf32>
    tpu.vector_store %arg11[%c0_126, %c0_127, %c0_128], %144 {strides = array<i32>} : memref<1x24x128xf32, #tpu.memory_space<vmem>>, vector<1x24x128xf32>,
    return
  }
  func.func @transform_0(%arg0: i32) -> (i32, i32, i32, i32) {
    %c0_i32 = arith.constant 0 : i32
    %c0_i32_0 = arith.constant 0 : i32
    %c0_i32_1 = arith.constant 0 : i32
    %c0_i32_2 = arith.constant 0 : i32
    return %arg0, %c0_i32, %c0_i32_0, %c0_i32_1 : i32, i32, i32, i32
  }
  func.func @transform_1(%arg0: i32) -> (i32, i32) {
    %c0_i32 = arith.constant 0 : i32
    %c0_i32_0 = arith.constant 0 : i32
    %c0_i32_1 = arith.constant 0 : i32
    return %c0_i32, %c0_i32_0 : i32, i32
  }
  func.func @transform_2(%arg0: i32) -> (i32, i32) {
    %c0_i32 = arith.constant 0 : i32
    %c0_i32_0 = arith.constant 0 : i32
    %c0_i32_1 = arith.constant 0 : i32
    return %c0_i32, %c0_i32_0 : i32, i32
  }
  func.func @transform_3(%arg0: i32) -> (i32, i32) {
    %c0_i32 = arith.constant 0 : i32
    %c0_i32_0 = arith.constant 0 : i32
    %c0_i32_1 = arith.constant 0 : i32
    return %c0_i32, %c0_i32_0 : i32, i32
  }
  func.func @transform_4(%arg0: i32) -> (i32, i32, i32) {
    %c0_i32 = arith.constant 0 : i32
    %c0_i32_0 = arith.constant 0 : i32
    %c0_i32_1 = arith.constant 0 : i32
    %c0_i32_2 = arith.constant 0 : i32
    return %c0_i32, %c0_i32_0, %c0_i32_1 : i32, i32, i32
  }
  func.func @transform_5(%arg0: i32) -> (i32, i32) {
    %c0_i32 = arith.constant 0 : i32
    %c0_i32_0 = arith.constant 0 : i32
    %c0_i32_1 = arith.constant 0 : i32
    return %c0_i32, %c0_i32_0 : i32, i32
  }
  func.func @transform_6(%arg0: i32) -> (i32, i32) {
    %c0_i32 = arith.constant 0 : i32
    %c0_i32_0 = arith.constant 0 : i32
    %c0_i32_1 = arith.constant 0 : i32
    return %c0_i32, %c0_i32_0 : i32, i32
  }
  func.func @transform_7(%arg0: i32) -> (i32, i32) {
    %c0_i32 = arith.constant 0 : i32
    %c0_i32_0 = arith.constant 0 : i32
    %c0_i32_1 = arith.constant 0 : i32
    return %c0_i32, %c0_i32_0 : i32, i32
  }
  func.func @transform_8(%arg0: i32) -> (i32, i32) {
    %c0_i32 = arith.constant 0 : i32
    %c0_i32_0 = arith.constant 0 : i32
    %c0_i32_1 = arith.constant 0 : i32
    return %c0_i32, %c0_i32_0 : i32, i32
  }
  func.func @transform_9(%arg0: i32) -> (i32, i32) {
    %c0_i32 = arith.constant 0 : i32
    %c0_i32_0 = arith.constant 0 : i32
    %c0_i32_1 = arith.constant 0 : i32
    return %c0_i32, %c0_i32_0 : i32, i32
  }
  func.func @transform_10(%arg0: i32) -> (i32, i32, i32) {
    %c0_i32 = arith.constant 0 : i32
    %c0_i32_0 = arith.constant 0 : i32
    %c0_i32_1 = arith.constant 0 : i32
    return %arg0, %c0_i32, %c0_i32_0 : i32, i32, i32
  }
}

</mosaic_0001>

<bundles_post_ra>
// kernel: tpu_custom_call.1
= control target key start
LH: loop header
LB: loop body
LE: loop exit
PB: predicated region body
PF: predicated region fallthrough
CT: control target
= control target key end

     0   :  { %s4305_s0 = inlined_call_operand.hbm [shape: f32[2,4,48,128], index: 0, kind: input, shape index: {}]   ;;  %s4306_s1 = inlined_call_operand.vmem [shape: f32[48,1], index: 1, kind: input, shape index: {}]   ;;  %s4307_s2 = inlined_call_operand.hbm [shape: bf16[128,128], index: 2, kind: input, shape index: {}]   ;;  %s4308_s3 = inlined_call_operand.vmem [shape: f32[1,128], index: 3, kind: input, shape index: {}]   ;;  %s4309_s4 = inlined_call_operand.hbm [shape: bf16[9,128,128], index: 4, kind: input, shape index: {}]   ;;  %s4310_s5 = inlined_call_operand.vmem [shape: f32[1,128], index: 5, kind: input, shape index: {}]   ;;  %s4311_s6 = inlined_call_operand.vmem [shape: bf16[128,128], index: 6, kind: input, shape index: {}]   ;;  %s4312_s7 = inlined_call_operand.vmem [shape: f32[1,128], index: 7, kind: input, shape index: {}]   ;;  %s4313_s8 = inlined_call_operand.hbm [shape: bf16[128,128], index: 8, kind: input, shape index: {}]   ;;  %s4314_s9 = inlined_call_operand.vmem [shape: f32[1,128], index: 9, kind: input, shape index: {}]   ;;  %s4315_s10 = inlined_call_operand.hbm [shape: f32[2,24,128], index: 10, kind: output, shape index: {}]  }
   0x1   :  { %4322 = sst [smem:[#allocation18_spill]] %s4312_s7 }
   0x2   :  { %4323 = sst [smem:[#allocation19_spill]] %s4315_s10 }
   0x3   :  { %15 = vsyncpa [#allocation4], 0 }
   0x4   :  { %17 = vsyncpa [#allocation4 + $0x1], 0 }
   0x5   :  { %18 = vsyncpa [#allocation7], 0 }
   0x6   :  { %19 = vsyncpa [#allocation10], 0 }
   0x7   :  { %20 = vsyncpa [#allocation5], 0 }
   0x8   :  { %22 = vsyncpa [#allocation5 + $0x1], 0  ;;  %s3774_s13 = smov 0   ;;  %s3776_s14 = smov 0  }
   0x9   :  { %s3778_s15 = smov 0   ;;  %s3780_s16 = smov 0  }
   0xa LB: > { %4324 = sst [smem:[#allocation16_spill]] %s3691_s13  ;;  %s3795_s17 = sadd.s32 4294967295, %s3703_s16   ;;  %s3703_s16 = sphi %s3780_s16, %s4350_s16   ;;  %s3699_s15 = sphi %s3778_s15, %s4349_s15   ;;  %s3695_s14 = sphi %s3776_s14, %s4348_s14   ;;  %s3691_s13 = sphi %s3774_s13, %s4347_s13  }
   0xb   : > { %s2647_s18 = sadd.s32 4294967294, %s3703_s16   ;;  %p48_p0 = scmp.ne.s32.totalorder %s3695_s14, %s3691_s13 }
   0xc   : > { %p4316_p1 = scmp.eq.s32.totalorder %s3795_s17, 0  ;;  %p267_p3 = scmp.eq.s32.totalorder %s2647_s18, 1 }
   0xd   : > { %p2648_p5 = scmp.ge.s32.totalorder %s3703_s16, 1  ;;  %p274_p7 = scmp.lt.s32.totalorder %s3703_s16, 3 }
   0xe   : > { %p3804_p4 = por %p4316_p1, %p48_p0  ;;  %p3809_p6 = por %p267_p3, %p48_p0 }
   0xf   : > { %p3814_p8 = pnand %p2648_p5, %p274_p7  ;;  %s3705_s22 = smov [#allocation6]  }
  0x10   : > { %s4325_s19 = scalar_select %p3804_p4, 1, 0 }
  0x11   : > { %s4326_s20 = scalar_select %p3809_p6, 1, 0 }
  0x12   : > { %s4328_s21 = scalar_select %p3814_p8, 1, 0 }
  0x13   : > { %4327 = sst [smem:[#allocation17_spill]] %s4326_s20  ;;  %s289_s23 = sshll.u32 %s3705_s22, 4  ;;  %s3818_s23 = int_to_ptr.vmem [resolvable:$true] %s289_s23 }
  0x14   : > { %p3323_p9 = pneg %p3814_p8  ;;  %s3706_s25 = smov [#allocation8]  }
  0x15   : > { %s305_s26 = sshll.u32 %s3706_s25, 4  ;;  %s3707_s27 = smov [#allocation9]   ;;  %s3829_s26 = int_to_ptr.vmem [resolvable:$true] %s305_s26 }
  0x16   : > { %p3825_p11 = pnand %p3323_p9, %p4316_p1  ;;  %s3831_s28 = sshll.u32 %s3707_s27, 4  ;;  %s328_s28 = int_to_ptr.vmem [resolvable:$true] %s3831_s28 }
  0x17   : > { %s3515_s11 = scalar_lea.hbm %s4307_s2, 1024 }
  0x18   : > { %p3516_p12 = scmp.ne.s32.totalorder %s4307_s2, %s3515_s11  ;;  %p3841_p13 = pneg %p3825_p11 }
  0x19   : > { %p3522_p5 = scmp.lt.u32.totalorder %s3515_s11, %s4307_s2 }
  0x1a   : > { %p3518_p0 = pnand %p3841_p13, %p3516_p12 }
  0x1c   : > { %p3519_p3 = pneg %p3518_p0 }
  0x1e   : > { %p3524_p7 = pnand %p3522_p5, %p3519_p3 }
  0x20   : > { %3527 = shalt.err (!%p3524_p7)
}
  0x21   : > { %s3528_s29 = scalar_lea.vmem %s3818_s23, 1024  ;;  %p3536_p2 = scmp.lt.s32.totalorder %s3818_s23, %s3818_s23 }
  0x22   : > { %p3529_p9 = scmp.ne.s32.totalorder %s3818_s23, %s3528_s29  ;;  %p3537_p6 = scmp.lt.s32.totalorder %s3528_s29, %s3528_s29 }
  0x24   : > { %p3531_p10 = pnand %p3529_p9, %p3841_p13  ;;  %p3538_p12 = por %p3537_p6, %p3536_p2 }
  0x26   : > { %p3532_p1 = pneg %p3531_p10 }
  0x28   : > { %p3539_p0 = pnand %p3538_p12, %p3532_p1 }
  0x2a   : > { %3542 = shalt.err (!%p3539_p0)
}
  0x2b   : > { %s3708_s30 = smov 64   ;;  %s3709_s11 = smov 4  }
  0x2c   : > { %3326 = dma.hbm_to_vmem [thread:$0]  (!%p3825_p11), %s4307_s2, 1024, %s3818_s23, [#allocation7], %s3708_s30, %s3708_s30, %s3709_s11  }
  0x2d   : > { %s3543_s29 = scalar_lea.hbm %s4309_s4, 9216 }
  0x2e   : > { %p3544_p1 = scmp.ne.s32.totalorder %s4309_s4, %s3543_s29  ;;  %p3550_p10 = scmp.lt.u32.totalorder %s3543_s29, %s4309_s4 }
  0x30   : > { %p3546_p2 = pnand %p3544_p1, %p3841_p13 }
  0x32   : > { %p3547_p6 = pneg %p3546_p2 }
  0x34   : > { %p3552_p3 = pnand %p3550_p10, %p3547_p6 }
  0x36   : > { %3555 = shalt.err (!%p3552_p3)
}
  0x37   : > { %s3556_s23 = scalar_lea.vmem %s3829_s26, 9216  ;;  %p3564_p12 = scmp.lt.s32.totalorder %s3829_s26, %s3829_s26 }
  0x38   : > { %p3557_p5 = scmp.ne.s32.totalorder %s3829_s26, %s3556_s23  ;;  %p3565_p0 = scmp.lt.s32.totalorder %s3556_s23, %s3556_s23 }
  0x3a   : > { %p3559_p7 = pnand %p3557_p5, %p3841_p13  ;;  %p3566_p1 = por %p3565_p0, %p3564_p12 }
  0x3c   : > { %p3560_p9 = pneg %p3559_p7 }
  0x3e   : > { %p3567_p2 = pnand %p3566_p1, %p3560_p9 }
  0x40   : > { %3570 = shalt.err (!%p3567_p2)
}
  0x41   : > { %3329 = dma.hbm_to_vmem [thread:$0]  (!%p3825_p11), %s4309_s4, 9216, %s3829_s26, [#allocation7], %s3708_s30, %s3708_s30, %s3709_s11  }
  0x42   : > { %s3571_s12 = scalar_lea.hbm %s4313_s8, 1024 }
  0x43   : > { %p3572_p6 = scmp.ne.s32.totalorder %s4313_s8, %s3571_s12  ;;  %p3578_p5 = scmp.lt.u32.totalorder %s3571_s12, %s4313_s8 }
  0x45   : > { %p3574_p10 = pnand %p3572_p6, %p3841_p13 }
  0x47   : > { %p3575_p3 = pneg %p3574_p10 }
  0x49   : > { %p3580_p7 = pnand %p3578_p5, %p3575_p3 }
  0x4b   : > { %3583 = shalt.err (!%p3580_p7)
}
  0x4c   : > { %s3584_s23 = scalar_lea.vmem %s328_s28, 1024  ;;  %p3592_p1 = scmp.lt.s32.totalorder %s328_s28, %s328_s28 }
  0x4d   : > { %p3585_p9 = scmp.ne.s32.totalorder %s328_s28, %s3584_s23  ;;  %p3593_p2 = scmp.lt.s32.totalorder %s3584_s23, %s3584_s23 }
  0x4f   : > { %p3587_p12 = pnand %p3585_p9, %p3841_p13  ;;  %p3594_p4 = por %p3593_p2, %p3592_p1 }
  0x51   : > { %p3588_p0 = pneg %p3587_p12 }
  0x53   : > { %p3595_p8 = pnand %p3594_p4, %p3588_p0 }
  0x55   : > { %3598 = shalt.err (!%p3595_p8)
}
  0x56   : > { %3332 = dma.hbm_to_vmem [thread:$0]  (!%p3825_p11), %s4313_s8, 1024, %s328_s28, [#allocation10], %s3708_s30, %s3708_s30, %s3709_s11  }
  0x57   : > { %s3914_s22 = sadd.s32 1, %s3703_s16   ;;  %s35_s10 = sadd.s32 1, %s3699_s15 }
  0x58   : > { %s32_s24 = ssub.s32 %s3703_s16, %s3914_s22  ;;  %p42_p8 = scmp.ne.s32.totalorder %s3699_s15, %s3695_s14 }
  0x59   : > { %p33_p4 = scmp.eq.s32.totalorder %s32_s24, 0  ;;  %p43_p13 = scmp.eq.s32.totalorder %s3703_s16, 0 }
  0x5a   : > { %p3344_p6 = scmp.lt.s32.totalorder %s3703_s16, 2  ;;  %p4331_p3 = scmp.eq.s32.totalorder %s3795_s17, 1 }
  0x5b   : > { %s3924_s13 = scalar_select %p33_p4, %s3699_s15, %s35_s10  }
  0x5c   : > { %p44_p10 = por %p43_p13, %p42_p8  ;;  %p3928_p5 = por %p4331_p3, %p42_p8 }
  0x5d   : > { %s344_s12 = sand.u32 1, %s3699_s15   ;;  %s3303_s18 = smul.u32 3072, %s3703_s16 }
  0x5e   : > { %s3302_s28 = smul.u32 192, %s344_s12  ;;  %p3939_p11 = pnand %p3344_p6, %p44_p10 }
  0x5f   : > { %s3937_s25 = scalar_lea.hbm %s4305_s0, %s3303_s18  ;;  %s3945_s26 = scalar_lea.sflag [#allocation4], %s344_s12 }
  0x60   : > { %s348_s29 = scalar_lea.vmem [#allocation3], %s3302_s28  ;;  %s3599_s7 = scalar_lea.hbm %s3937_s25, 3072 }
  0x61   : > { %s355_s23 = sshll.u32 %s348_s29, 4  ;;  %p3600_p7 = scmp.ne.s32.totalorder %s3937_s25, %s3599_s7  ;;  %s3943_s23 = int_to_ptr.vmem [resolvable:$true] %s355_s23 }
  0x62   : > { %p3601_p9 = pneg %p3939_p11  ;;  %s3604_s18 = scalar_lea.hbm %s4305_s0, 6144 }
  0x63   : > { %p3605_p1 = scmp.lt.u32.totalorder %s3937_s25, %s4305_s0  ;;  %p3606_p2 = scmp.lt.u32.totalorder %s3604_s18, %s3599_s7 }
  0x64   : > { %p3602_p12 = pnand %p3601_p9, %p3600_p7  ;;  %p3608_p8 = scmp.lt.u32.totalorder %s3599_s7, %s3937_s25 }
  0x65   : > { %p3607_p4 = por %p3606_p2, %p3605_p1 }
  0x66   : > { %p3603_p0 = pneg %p3602_p12 }
  0x67   : > { %p3609_p13 = por %p3608_p8, %p3607_p4 }
  0x69   : > { %p3610_p6 = pnand %p3609_p13, %p3603_p0 }
  0x6b   : > { %3613 = shalt.err (!%p3610_p6)
}
  0x6c   : > { %s3614_s12 = scalar_lea.vmem %s3943_s23, 3072  ;;  %s3710_s28 = smov [#allocation3]  }
  0x6d   : > { %p3615_p10 = scmp.ne.s32.totalorder %s3943_s23, %s3614_s12  ;;  %s3619_s29 = sshll.u32 %s3710_s28, 4  ;;  %s3620_s29 = int_to_ptr.vmem [resolvable:$false] %s3619_s29 }
  0x6e   : > { %s3621_s24 = scalar_lea.vmem %s3620_s29, 6144  ;;  %p3622_p12 = scmp.lt.s32.totalorder %s3943_s23, %s3620_s29 }
  0x6f   : > { %p3617_p3 = pnand %p3615_p10, %p3601_p9  ;;  %p3623_p1 = scmp.lt.s32.totalorder %s3621_s24, %s3614_s12 }
  0x71   : > { %p3618_p7 = pneg %p3617_p3  ;;  %p3624_p2 = por %p3623_p1, %p3622_p12 }
  0x73   : > { %p3625_p4 = pnand %p3624_p2, %p3618_p7 }
  0x75   : > { %3628 = shalt.err (!%p3625_p4)
}
  0x76   : > { %s3711_s7 = smov 128   ;;  %s3712_s10 = smov 8  }
  0x77   : > { %3336 = dma.hbm_to_vmem [thread:$0]  (!%p3939_p11), %s3937_s25, 3072, %s3943_s23, %s3945_s26, %s3711_s7, %s3711_s7, %s3712_s10  }
  0x78   : > { %p4334_p9 = scmp.ne.s32.totalorder %s4328_s21, 0 }
  0x79   : > { %s3976_s18 = sand.u32 (!%p4334_p9), 1, %s3695_s14   ;;  %p4335_p0 = scmp.ne.s32.totalorder (!%p4334_p9), %s4325_s19, 0 }
  0x7a   : > { %367 = sbr.rel (%p4334_p9) target bundleno = 1034 (0x40a), region = 60  ;;  %s370_s11 = scalar_lea.sflag (!%p4334_p9), [#allocation4], %s3976_s18 }
  0x7b   : > { %s3304_s30 = smul.u32 (!%p4334_p9), 192, %s3976_s18 }
  0x7d   : > { %s3980_s12 = scalar_lea.vmem (!%p4334_p9), [#allocation3], %s3304_s30 }
  0x81   : > { %3674 = dma.done.wait (%p4335_p0), %s370_s11, 3072  }
  0x82   : > { %3676 = vsyncadd (%p4335_p0), %s370_s11, 4294964224  ;;  %p4336_p11 = scmp.eq.s32.totalorder %s3795_s17, 0 }
  0x84   : > { %3678 = dma.done.wait (%p4336_p11), [#allocation7], 10240   ;;  %p4337_p8 = pmov %p4336_p11 }
  0x86   : > { %3680 = vsyncadd (%p4337_p8), [#allocation7], 4294957056  ;;  %p4338_p13 = pmov %p4337_p8 }
  0x87   : > { %p4339_p6 = pmov %p4337_p8 }
  0x88   : > { %3682 = dma.done.wait (%p4338_p13), [#allocation10], 1024  }
  0x89   : > { %3684 = vsyncadd (%p4339_p6), [#allocation10], 4294966272  ;;  %v3713_v0 = vmov 0.0   ;;  %vm3714_vm0 = vmmov 0   ;;  %v3715_v1 = vmov 0   ;;  %v3395_v2 = vld [vmem:[#allocation6] sm:$0xff]  }
  0x8a   : > { %2960 = vmatprep.subr.bf16.mxu0 %v3713_v0  ;;  %2988 = vmatprep.subr.bf16.mxu1 %v3713_v0  ;;  %v3396_v3 = vld [vmem:[#allocation6] sm:$0xff]   ;;  %v3397_v4 = vld [vmem:[#allocation6 + $0x8] sm:$0xff]   ;;  %v3399_v6 = vld [vmem:[#allocation6 + $0x10] sm:$0xff]   ;;  %vm1487_vm1 = vcmask 1044480   ;;  %vm1122_vm2 = vsmask.f32 7424 }
  0x8b   : > { %2976 = vmatprep.mubr.msk.bf16.mxu0 %vm3714_vm0, %v3713_v0  ;;  %3004 = vmatprep.mubr.msk.bf16.mxu1 %vm3714_vm0, %v3713_v0  ;;  %v3398_v5 = vld [vmem:[#allocation6 + $0x8] sm:$0xff]   ;;  %v3400_v7 = vld [vmem:[#allocation6 + $0x10] sm:$0xff]   ;;  %v3401_v8 = vld [vmem:[#allocation6 + $0x18] sm:$0xff]   ;;  %vm1611_vm3 = vsmask.f32 4352  ;;  %s3305_s26 = smul.u32 24, %s3976_s18 }
  0x8c   : > { %3393 = vset.pattern.permute.xlu0 %v3715_v1  ;;  %3394 = vset.pattern.permute.xlu1 %v3715_v1  ;;  %v3402_v9 = vld [vmem:[#allocation6 + $0x18] sm:$0xff]   ;;  %v3403_v10 = vld [vmem:[#allocation6 + $0x20] sm:$0xff]   ;;  %v3405_v12 = vld [vmem:[#allocation6 + $0x28] sm:$0xff]   ;;  %s4340_s7 = sld [smem:[#allocation18_spill]]  ;;  %s3306_s11 = smul.u32 384, %s3795_s17 }
  0x8d   : > { %2961 = vmatpush3.bf16.msra.mxu0 %v3395_v2  ;;  %2989 = vmatpush3.bf16.msra.mxu1 %v3396_v3  ;;  %v3404_v11 = vld [vmem:[#allocation6 + $0x20] sm:$0xff]   ;;  %v3406_v13 = vld [vmem:[#allocation6 + $0x28] sm:$0xff]   ;;  %v3407_v14 = vld [vmem:[#allocation6 + $0x30] sm:$0xff]   ;;  %s421_s10 = scalar_lea.vmem [#allocation11], %s3305_s26  ;;  %s4341_s25 = sld [smem:[#allocation19_spill]] }
  0x8e   : > { %2962 = vmatprep.subr.bf16.mxu0 %v3713_v0  ;;  %2990 = vmatprep.subr.bf16.mxu1 %v3713_v0  ;;  %v3408_v15 = vld [vmem:[#allocation6 + $0x30] sm:$0xff]   ;;  %v3409_v16 = vld [vmem:[#allocation6 + $0x38] sm:$0xff]   ;;  %v429_v18 = vld [vmem:[%s3980_s12] sm:$0xff]  ;;  %s2545_s30 = sshll.u32 %s421_s10, 4  ;;  %s2532_s17 = scalar_lea.sflag [#allocation5], %s3976_s18  ;;  %s4256_s30 = int_to_ptr.vmem [resolvable:$true] %s2545_s30 }
  0x8f   : > { %v3410_v17 = vld [vmem:[#allocation6 + $0x38] sm:$0xff]   ;;  %v430_v19 = vld [vmem:[%s3980_s12 + $0x8] sm:$0xff]  ;;  %v2667_v20 = vld [vmem:[%s3980_s12 + $0x30] sm:$0xff]  ;;  %s3629_s23 = scalar_lea.vmem %s4256_s30, 384  ;;  %s3716_s26 = smov [#allocation11]  }
  0x90   : > { %v2668_v21 = vld [vmem:[%s3980_s12 + $0x38] sm:$0xff]  ;;  %v435_v22 = vpack.c.bf16 %v430_v19, %v429_v18  ;;  %v3411_v24 = vld [vmem:[#allocation6] sm:$0xff]   ;;  %v3413_v26 = vld [vmem:[#allocation6 + $0x8] sm:$0xff]   ;;  %p3630_p10 = scmp.ne.s32.totalorder %s4256_s30, %s3629_s23  ;;  %s3633_s28 = sshll.u32 %s3716_s26, 4  ;;  %s3634_s28 = int_to_ptr.vmem [resolvable:$false] %s3633_s28 }
  0x91   : > { %2963 = vmatpush3.bf16.msra.mxu0 %v3397_v4  ;;  %2991 = vmatpush3.bf16.msra.mxu1 %v3398_v5  ;;  %v621_v23 = vpack.c.bf16 %v2668_v21, %v2667_v20  ;;  %v3412_v25 = vld [vmem:[#allocation6] sm:$0xff]   ;;  %v431_v27 = vld [vmem:[%s3980_s12 + $0x10] sm:$0xff]  ;;  %v3414_v28 = vld [vmem:[#allocation6 + $0x8] sm:$0xff]   ;;  %p3636_p12 = scmp.lt.s32.totalorder %s4256_s30, %s3634_s28 }
  0x92   : > { %2964 = vmatprep.subr.bf16.mxu0 %v3713_v0  ;;  %2992 = vmatprep.subr.bf16.mxu1 %v3713_v0  ;;  %v432_v29 = vld [vmem:[%s3980_s12 + $0x18] sm:$0xff]  ;;  %v2669_v30 = vld [vmem:[%s3980_s12 + $0x40] sm:$0xff]  ;;  %v2670_v31 = vld [vmem:[%s3980_s12 + $0x48] sm:$0xff]  ;;  %p3631_p3 = pnand %p3630_p10, %p3928_p5 }
  0x93   : > { %v436_v32 = vpack.c.bf16 %v432_v29, %v431_v27  ;;  %v3415_v33 = vld [vmem:[#allocation6 + $0x10] sm:$0xff]   ;;  %v622_v34 = vpack.c.bf16 %v2670_v31, %v2669_v30  ;;  %v3417_v36 = vld [vmem:[#allocation6 + $0x18] sm:$0xff]   ;;  %v433_v37 = vld [vmem:[%s3980_s12 + $0x20] sm:$0xff]  ;;  %s4261_s27 = scalar_lea.hbm %s4341_s25, %s3306_s11 }
  0x94   : > { %v3416_v35 = vld [vmem:[#allocation6 + $0x10] sm:$0xff]   ;;  %v434_v38 = vld [vmem:[%s3980_s12 + $0x28] sm:$0xff]  ;;  %v423_v39 = vld [vmem:[%s4306_s1] sm:$0xff]  ;;  %p3632_p7 = pneg %p3631_p3 }
  0x95   : > { %2965 = vmatpush3.bf16.msra.mxu0 %v3399_v6  ;;  %2993 = vmatpush3.bf16.msra.mxu1 %v3400_v7  ;;  %v3418_v40 = vld [vmem:[#allocation6 + $0x18] sm:$0xff]   ;;  %v2671_v41 = vld [vmem:[%s3980_s12 + $0x50] sm:$0xff]  ;;  %v424_v43 = vld [vmem:[%s4306_s1 + $0x8] sm:$0xff]  ;;  %v437_v48 = vpack.c.bf16 %v434_v38, %v433_v37 }
  0x96   : > { %2966 = vmatprep.subr.bf16.mxu0 %v3713_v0  ;;  %2994 = vmatprep.subr.bf16.mxu1 %v3713_v0  ;;  %v2672_v42 = vld [vmem:[%s3980_s12 + $0x58] sm:$0xff]  ;;  %v425_v44 = vld [vmem:[%s4306_s1 + $0x10] sm:$0xff]  ;;  %v3419_v45 = vld [vmem:[#allocation6 + $0x20] sm:$0xff]  }
  0x97   : > { %574 = vperm.xlu0 %3393, %v423_v39   ;;  %v427_v46 = vld [vmem:[%s4306_s1 + $0x20] sm:$0xff]  ;;  %v623_v49 = vpack.c.bf16 %v2672_v42, %v2671_v41  ;;  %584 = vperm.xlu1 %3394, %v425_v44   ;;  %v3421_v50 = vld [vmem:[#allocation6 + $0x28] sm:$0xff]   ;;  %v426_v51 = vld [vmem:[%s4306_s1 + $0x18] sm:$0xff] }
  0x98   : > { %v3420_v47 = vld [vmem:[#allocation6 + $0x20] sm:$0xff]   ;;  %v3422_v52 = vld [vmem:[#allocation6 + $0x28] sm:$0xff]   ;;  %v3423_v53 = vld [vmem:[#allocation6 + $0x30] sm:$0xff]  }
  0x99   : > { %2967 = vmatpush3.bf16.msra.mxu0 %v3401_v8  ;;  %2995 = vmatpush3.bf16.msra.mxu1 %v3402_v9  ;;  %v428_v54 = vld [vmem:[%s4306_s1 + $0x28] sm:$0xff]  ;;  %v3424_v55 = vld [vmem:[#allocation6 + $0x30] sm:$0xff]   ;;  %v3425_v56 = vld [vmem:[#allocation6 + $0x38] sm:$0xff]  }
  0x9a   : > { %2968 = vmatprep.subr.bf16.mxu0 %v3713_v0  ;;  %2996 = vmatprep.subr.bf16.mxu1 %v3713_v0  ;;  %v2682_v57 = vld [vmem:[%s3980_s12 + $0x60] sm:$0xff]  ;;  %v2683_v58 = vld [vmem:[%s3980_s12 + $0x68] sm:$0xff]  ;;  %v3426_v59 = vld [vmem:[#allocation6 + $0x38] sm:$0xff]  }
  0x9b   : > { %579 = vperm.xlu0 %3393, %v424_v43   ;;  %589 = vperm.xlu1 %3394, %v426_v51   ;;  %v2697_v60 = vld [vmem:[%s3980_s12 + $0x90] sm:$0xff]  ;;  %v2698_v61 = vld [vmem:[%s3980_s12 + $0x98] sm:$0xff]  ;;  %v778_v62 = vpack.c.bf16 %v2683_v58, %v2682_v57  ;;  %v2699_v3 = vld [vmem:[%s3980_s12 + $0xa0] sm:$0xff] }
  0x9c   : > { %v935_v63 = vpack.c.bf16 %v2698_v61, %v2697_v60  ;;  %v2684_v1 = vld [vmem:[%s3980_s12 + $0x70] sm:$0xff]  ;;  %v2685_v2 = vld [vmem:[%s3980_s12 + $0x78] sm:$0xff]  ;;  %v2700_v4 = vld [vmem:[%s3980_s12 + $0xa8] sm:$0xff] }
  0x9d   : > { %2969 = vmatpush3.bf16.msra.mxu0 %v3403_v10  ;;  %2997 = vmatpush3.bf16.msra.mxu1 %v3404_v11  ;;  %v779_v5 = vpack.c.bf16 %v2685_v2, %v2684_v1  ;;  %v936_v6 = vpack.c.bf16 %v2700_v4, %v2699_v3  ;;  %v2686_v7 = vld [vmem:[%s3980_s12 + $0x80] sm:$0xff]  ;;  %v2687_v8 = vld [vmem:[%s3980_s12 + $0x88] sm:$0xff]  ;;  %v2701_v9 = vld [vmem:[%s3980_s12 + $0xb0] sm:$0xff] }
  0x9e   : > { %2970 = vmatprep.subr.bf16.mxu0 %v3713_v0  ;;  %2998 = vmatprep.subr.bf16.mxu1 %v3713_v0  ;;  %v2702_v10 = vld [vmem:[%s3980_s12 + $0xb8] sm:$0xff]  ;;  %v780_v11 = vpack.c.bf16 %v2687_v8, %v2686_v7  ;;  %v3434_v19 = vld [vmem:[#allocation8 + $0x20] sm:$0xff]   ;;  %v3436_v21 = vld [vmem:[#allocation8 + $0x28] sm:$0xff]  }
  0x9f   : > { %594 = vperm.xlu0 %3393, %v427_v46   ;;  %599 = vperm.xlu1 %3394, %v428_v54   ;;  %v3432_v18 = vld [vmem:[#allocation8 + $0x18] sm:$0xff]   ;;  %v4092_v27 = vld [vmem:[#allocation8 + $0xc0] sm:$0xff]  }
  0xa0   : > { %v3435_v20 = vld [vmem:[#allocation8 + $0x58] sm:$0xff]   ;;  %v4095_v29 = vld [vmem:[#allocation8 + $0x80] sm:$0xff]  }
  0xa1   : > { %2971 = vmatpush3.bf16.msra.mxu0 %v3405_v12  ;;  %2999 = vmatpush3.bf16.msra.mxu1 %v3406_v13  ;;  %v937_v12 = vpack.c.bf16 %v2702_v10, %v2701_v9  ;;  %v3427_v13 = vld [vmem:[#allocation8] sm:$0xff]  }
  0xa2   : > { %2972 = vmatprep.subr.bf16.mxu0 %v3713_v0  ;;  %3000 = vmatprep.subr.bf16.mxu1 %v3713_v0  ;;  %v4101_v30 = vld [vmem:[%s4308_s3] ss:$0 sm:$0xff] }
  0xa5   : > { %2973 = vmatpush3.bf16.msra.mxu0 %v3407_v14  ;;  %3001 = vmatpush3.bf16.msra.mxu1 %v3408_v15  ;;  %v3428_v14 = vld [vmem:[#allocation8 + $0x8] sm:$0xff]   ;;  %v3429_v15 = vld [vmem:[#allocation8 + $0x40] sm:$0xff]  }
  0xa6   : > { %2974 = vmatprep.subr.bf16.mxu0 %v3713_v0  ;;  %3002 = vmatprep.subr.bf16.mxu1 %v3713_v0 }
  0xa9   : > { %2975 = vmatpush3.bf16.msra.mxu0 %v3409_v16  ;;  %3003 = vmatpush3.bf16.msra.mxu1 %v3410_v17  ;;  %v3430_v16 = vld [vmem:[#allocation8 + $0x10] sm:$0xff]   ;;  %v3431_v17 = vld [vmem:[#allocation8 + $0x48] sm:$0xff]  }
  0xaa   : > { %3016 = vmatprep.subr.bf16.mxu0 %v3713_v0  ;;  %3044 = vmatprep.subr.bf16.mxu1 %v3713_v0 }
  0xac   : > { %2977 = vmatmul.mubr.bf16.vlgmr.msra.gmra.mrb[0].mxu0 %v435_v22  ;;  %3005 = vmatmul.mubr.bf16.vlgmr.msra.gmra.mrb[0].mxu1 %v621_v23  ;;  %v3437_v22 = vld [vmem:[#allocation8 + $0x60] sm:$0xff]   ;;  %v3438_v23 = vld [vmem:[#allocation8 + $0x30] sm:$0xff]  }
  0xad   : > { %3017 = vmatpush3.bf16.msra.mxu0 %v3411_v24  ;;  %3045 = vmatpush3.bf16.msra.mxu1 %v3412_v25  ;;  %v3439_v24 = vld [vmem:[#allocation8 + $0x68] sm:$0xff]   ;;  %v3440_v25 = vld [vmem:[#allocation8 + $0x38] sm:$0xff]  }
  0xae   : > { %3018 = vmatprep.subr.bf16.mxu0 %v3713_v0  ;;  %3046 = vmatprep.subr.bf16.mxu1 %v3713_v0 }
  0xaf   : > { %2980 = vmatprep.mubr.msk.bf16.mxu0 %vm3714_vm0, %v3713_v0  ;;  %3008 = vmatprep.mubr.msk.bf16.mxu1 %vm3714_vm0, %v3713_v0 }
  0xb1   : > { %3019 = vmatpush3.bf16.msra.mxu0 %v3413_v26  ;;  %3047 = vmatpush3.bf16.msra.mxu1 %v3414_v28  ;;  %v3441_v26 = vld [vmem:[#allocation8 + $0x70] sm:$0xff]   ;;  %v3443_v28 = vld [vmem:[#allocation8 + $0x78] sm:$0xff]  }
  0xb2   : > { %3020 = vmatprep.subr.bf16.mxu0 %v3713_v0  ;;  %3048 = vmatprep.subr.bf16.mxu1 %v3713_v0 }
  0xb4   : > { %2981 = vmatmul.mubr.bf16.gmra.mrb[4].mxu0 %v436_v32  ;;  %3009 = vmatmul.mubr.bf16.gmra.mrb[4].mxu1 %v622_v34 }
  0xb5   : > { %3021 = vmatpush3.bf16.msra.mxu0 %v3415_v33  ;;  %3049 = vmatpush3.bf16.msra.mxu1 %v3416_v35 }
  0xb6   : > { %3022 = vmatprep.subr.bf16.mxu0 %v3713_v0  ;;  %3050 = vmatprep.subr.bf16.mxu1 %v3713_v0 }
  0xb7   : > { %2984 = vmatprep.mubr.msk.bf16.mxu0 %vm3714_vm0, %v3713_v0  ;;  %3012 = vmatprep.mubr.msk.bf16.mxu1 %vm3714_vm0, %v3713_v0 }
  0xb9   : > { %3023 = vmatpush3.bf16.msra.mxu0 %v3417_v36  ;;  %3051 = vmatpush3.bf16.msra.mxu1 %v3418_v40 }
  0xba   : > { %3024 = vmatprep.subr.bf16.mxu0 %v3713_v0  ;;  %3052 = vmatprep.subr.bf16.mxu1 %v3713_v0 }
  0xbc   : > { %2985 = vmatmul.mubr.bf16.gmra.mrb[8].mxu0 %v437_v48  ;;  %3013 = vmatmul.mubr.bf16.gmra.mrb[8].mxu1 %v623_v49 }
  0xbd   : > { %3025 = vmatpush3.bf16.msra.mxu0 %v3419_v45  ;;  %3053 = vmatpush3.bf16.msra.mxu1 %v3420_v47 }
  0xbe   : > { %3026 = vmatprep.subr.bf16.mxu0 %v3713_v0  ;;  %3054 = vmatprep.subr.bf16.mxu1 %v3713_v0 }
  0xbf   : > { %3032 = vmatprep.mubr.msk.bf16.mxu0 %vm3714_vm0, %v3713_v0  ;;  %3060 = vmatprep.mubr.msk.bf16.mxu1 %vm3714_vm0, %v3713_v0 }
  0xc1   : > { %3027 = vmatpush3.bf16.msra.mxu0 %v3421_v50  ;;  %3055 = vmatpush3.bf16.msra.mxu1 %v3422_v52 }
  0xc2   : > { %3028 = vmatprep.subr.bf16.mxu0 %v3713_v0  ;;  %3056 = vmatprep.subr.bf16.mxu1 %v3713_v0 }
  0xc5   : > { %3029 = vmatpush3.bf16.msra.mxu0 %v3423_v53  ;;  %3057 = vmatpush3.bf16.msra.mxu1 %v3424_v55 }
  0xc6   : > { %3030 = vmatprep.subr.bf16.mxu0 %v3713_v0  ;;  %3058 = vmatprep.subr.bf16.mxu1 %v3713_v0 }
  0xc9   : > { %3031 = vmatpush3.bf16.msra.mxu0 %v3425_v56  ;;  %3059 = vmatpush3.bf16.msra.mxu1 %v3426_v59 }
  0xca   : > { %3092 = vmatprep.subr.bf16.mxu1 %v3427_v13  ;;  %3072 = vmatprep.subr.bf16.mxu0 %v3429_v15 }
  0xcc   : > { %3033 = vmatmul.mubr.bf16.vlgmr.msra.gmra.mrb[12].mxu0 %v778_v62  ;;  %3061 = vmatmul.mubr.bf16.vlgmr.msra.gmra.mrb[12].mxu1 %v935_v63 }
  0xcd   : > { %3036 = vmatprep.mubr.msk.bf16.mxu0 %vm3714_vm0, %v3713_v0  ;;  %3064 = vmatprep.mubr.msk.bf16.mxu1 %vm3714_vm0, %v3713_v0 }
  0xce   : > { %3093 = vmatpush3.bf16.msra.mxu1 %v3427_v13  ;;  %3073 = vmatpush3.bf16.msra.mxu0 %v3429_v15 }
  0xcf   : > { %3094 = vmatprep.subr.bf16.mxu1 %v3428_v14  ;;  %3074 = vmatprep.subr.bf16.mxu0 %v3431_v17 }
  0xd2   : > { %3095 = vmatpush3.bf16.msra.mxu1 %v3428_v14  ;;  %3075 = vmatpush3.bf16.msra.mxu0 %v3431_v17 }
  0xd3   : > { %3096 = vmatprep.subr.bf16.mxu1 %v3430_v16 }
  0xd4   : > { %3037 = vmatmul.mubr.bf16.gmra.mrb[16].mxu0 %v779_v5  ;;  %3065 = vmatmul.mubr.bf16.gmra.mrb[16].mxu1 %v936_v6 }
  0xd5   : > { %3040 = vmatprep.mubr.msk.bf16.mxu0 %vm3714_vm0, %v3713_v0  ;;  %3068 = vmatprep.mubr.msk.bf16.mxu1 %vm3714_vm0, %v3713_v0  ;;  %v3433_v0 = vld [vmem:[#allocation8 + $0x50] sm:$0xff]  }
  0xd6   : > { %3097 = vmatpush3.bf16.msra.mxu1 %v3430_v16  ;;  %3076 = vmatprep.subr.bf16.mxu0 %v3433_v0 }
  0xd7   : > { %3098 = vmatprep.subr.bf16.mxu1 %v3432_v18  ;;  %3077 = vmatpush3.bf16.msra.mxu0 %v3433_v0 }
  0xd8   : > { %3078 = vmatprep.subr.bf16.mxu0 %v3435_v20 }
  0xda   : > { %3099 = vmatpush3.bf16.msra.mxu1 %v3432_v18 }
  0xdb   : > { %3100 = vmatprep.subr.bf16.mxu1 %v3434_v19  ;;  %3079 = vmatpush3.bf16.msra.mxu0 %v3435_v20 }
  0xdc   : > { %3041 = vmatmul.mubr.bf16.gmra.mrb[20].mxu0 %v780_v11  ;;  %3069 = vmatmul.mubr.bf16.gmra.mrb[20].mxu1 %v937_v12 }
  0xdd   : > { %3080 = vmatprep.subr.bf16.mxu0 %v3437_v22 }
  0xde   : > { %3101 = vmatpush3.bf16.msra.mxu1 %v3434_v19 }
  0xdf   : > { %3102 = vmatprep.subr.bf16.mxu1 %v3436_v21  ;;  %3081 = vmatpush3.bf16.msra.mxu0 %v3437_v22 }
  0xe0   : > { %3082 = vmatprep.subr.bf16.mxu0 %v3439_v24 }
  0xe2   : > { %3103 = vmatpush3.bf16.msra.mxu1 %v3436_v21 }
  0xe3   : > { %3104 = vmatprep.subr.bf16.mxu1 %v3438_v23  ;;  %3083 = vmatpush3.bf16.msra.mxu0 %v3439_v24 }
  0xe4   : > { %3084 = vmatprep.subr.bf16.mxu0 %v3441_v26 }
  0xe6   : > { %3105 = vmatpush3.bf16.msra.mxu1 %v3438_v23 }
  0xe7   : > { %3106 = vmatprep.subr.bf16.mxu1 %v3440_v25  ;;  %3085 = vmatpush3.bf16.msra.mxu0 %v3441_v26 }
  0xe8   : > { %3086 = vmatprep.subr.bf16.mxu0 %v3443_v28 }
  0xea   : > { %3107 = vmatpush3.bf16.msra.mxu1 %v3440_v25 }
  0xeb   : > { %3132 = vmatprep.subr.bf16.mxu1 %v4092_v27  ;;  %3087 = vmatpush3.bf16.msra.mxu0 %v3443_v28 }
  0xec   : > { %3112 = vmatprep.subr.bf16.mxu0 %v4095_v29 }
 0x116   : > { %v4103_v31 = vpop.permute.xlu0 %574  ;;  %v4112_v49 = vpop.permute.xlu1 %584 }
 0x11a   : > { %v4108_v43 = vpop.permute.xlu0 %579  ;;  %v4120_v4 = vpop.permute.xlu1 %589 }
 0x11e   : > { %v595_v15 = vpop.permute.xlu0 %594  ;;  %v600_v23 = vpop.permute.xlu1 %599 }
 0x17f   : > { %v543_v32 = vpop.f32.mrb[0].mxu0  ;;  %v729_v35 = vpop.f32.mrb[0].mxu1 }
 0x180   : > { %v544_v33 = vadd.f32 %v4101_v30, %v543_v32  ;;  %v2978_v34 = vpop.f32.mrb[1].mxu0  ;;  %v730_v37 = vadd.f32 %v4101_v30, %v729_v35  ;;  %v3006_v38 = vpop.f32.mrb[1].mxu1 }
 0x181   : > { %v546_v36 = vpop.f32.mrb[2].mxu0  ;;  %v732_v42 = vpop.f32.mrb[2].mxu1 }
 0x182   : > { %v566_v39 = vmax.f32 %v544_v33, 0.0  ;;  %v547_v40 = vadd.f32 %v4101_v30, %v546_v36  ;;  %v2979_v41 = vpop.f32.mrb[3].mxu0  ;;  %v752_v44 = vmax.f32 %v730_v37, 0.0  ;;  %v733_v45 = vadd.f32 %v4101_v30, %v732_v42  ;;  %v3007_v46 = vpop.f32.mrb[3].mxu1 }
 0x184   : > { %v567_v47 = vmax.f32 %v547_v40, 0.0  ;;  %v602_v48 = vmul.f32 %v4103_v31, %v566_v39  ;;  %v758_v50 = vmul.f32 %v752_v44, %v4103_v31  ;;  %v753_v51 = vmax.f32 %v733_v45, 0.0 }
 0x186   : > { %v603_v52 = vmul.f32 %v4108_v43, %v567_v47  ;;  %v759_v54 = vmul.f32 %v753_v51, %v4108_v43 }
 0x187   : > { %v551_v53 = vpop.f32.mrb[4].mxu0  ;;  %v737_v58 = vpop.f32.mrb[4].mxu1 }
 0x188   : > { %v608_v55 = vpack.c.bf16 %v603_v52, %v602_v48  ;;  %v552_v56 = vadd.f32 %v4101_v30, %v551_v53  ;;  %v2982_v57 = vpop.f32.mrb[5].mxu0  ;;  %v764_v60 = vpack.c.bf16 %v759_v54, %v758_v50  ;;  %v738_v61 = vadd.f32 %v4101_v30, %v737_v58  ;;  %v3010_v62 = vpop.f32.mrb[5].mxu1 }
 0x189   : > { %v554_v59 = vpop.f32.mrb[6].mxu0  ;;  %v740_v3 = vpop.f32.mrb[6].mxu1 }
 0x18a   : > { %611 = vst [vmem:[#allocation2] sm:$0xff] %v608_v55  ;;  %v568_v63 = vmax.f32 %v552_v56, 0.0  ;;  %v555_v1 = vadd.f32 %v4101_v30, %v554_v59  ;;  %v2983_v2 = vpop.f32.mrb[7].mxu0  ;;  %768 = vst [vmem:[#allocation2 + $0x18] sm:$0xff] %v764_v60  ;;  %v754_v5 = vmax.f32 %v738_v61, 0.0  ;;  %v741_v6 = vadd.f32 %v4101_v30, %v740_v3  ;;  %v3011_v7 = vpop.f32.mrb[7].mxu1 }
 0x18c   : > { %v569_v8 = vmax.f32 %v555_v1, 0.0  ;;  %v604_v9 = vmul.f32 %v4112_v49, %v568_v63  ;;  %v760_v10 = vmul.f32 %v754_v5, %v4112_v49  ;;  %v755_v11 = vmax.f32 %v741_v6, 0.0 }
 0x18e   : > { %v605_v12 = vmul.f32 %v4120_v4, %v569_v8  ;;  %v761_v14 = vmul.f32 %v755_v11, %v4120_v4 }
 0x18f   : > { %v559_v13 = vpop.f32.mrb[8].mxu0  ;;  %v745_v18 = vpop.f32.mrb[8].mxu1 }
 0x190   : > { %v4127_v16 = vpack.c.bf16 %v605_v12, %v604_v9  ;;  %v2986_v17 = vpop.f32.mrb[9].mxu0  ;;  %v4129_v19 = vpack.c.bf16 %v761_v14, %v760_v10  ;;  %v3014_v20 = vpop.f32.mrb[9].mxu1 }
 0x191   : > { %v562_v0 = vpop.f32.mrb[10].mxu0  ;;  %v748_v22 = vpop.f32.mrb[10].mxu1 }
 0x192   : > { %v2987_v21 = vpop.f32.mrb[11].mxu0  ;;  %769 = vst [vmem:[#allocation2 + $0x20] sm:$0xff] %v4129_v19  ;;  %v3015_v24 = vpop.f32.mrb[11].mxu1 }
 0x199   : > { %v4158_v17 = vld [vmem:[#allocation2 + $0x20] sm:$0x7f] }
 0x19a   : > { %v1489_v22 = vrot.slane %v4158_v17, 3 }
 0x19f   : > { %v886_v25 = vpop.f32.mrb[12].mxu0  ;;  %v1043_v28 = vpop.f32.mrb[12].mxu1 }
 0x1a0   : > { %v887_v26 = vadd.f32 %v4101_v30, %v886_v25  ;;  %v3034_v32 = vpop.f32.mrb[13].mxu0  ;;  %v1044_v33 = vadd.f32 %v4101_v30, %v1043_v28  ;;  %v3062_v34 = vpop.f32.mrb[13].mxu1 }
 0x1a1   : > { %v889_v35 = vpop.f32.mrb[14].mxu0  ;;  %v1046_v38 = vpop.f32.mrb[14].mxu1 }
 0x1a2   : > { %v909_v36 = vmax.f32 %v887_v26, 0.0  ;;  %v890_v37 = vadd.f32 %v4101_v30, %v889_v35  ;;  %v3035_v39 = vpop.f32.mrb[15].mxu0  ;;  %v1066_v40 = vmax.f32 %v1044_v33, 0.0  ;;  %v1047_v41 = vadd.f32 %v4101_v30, %v1046_v38  ;;  %v3063_v42 = vpop.f32.mrb[15].mxu1 }
 0x1a4   : > { %v910_v44 = vmax.f32 %v890_v37, 0.0  ;;  %v1072_v45 = vmul.f32 %v1066_v40, %v4103_v31  ;;  %v1067_v46 = vmax.f32 %v1047_v41, 0.0  ;;  %v915_v47 = vmul.f32 %v909_v36, %v4103_v31  ;;  %v3444_v36 = vld [vmem:[#allocation8 + $0xc8] sm:$0xff]  }
 0x1a6   : > { %v916_v48 = vmul.f32 %v910_v44, %v4108_v43  ;;  %v1073_v50 = vmul.f32 %v1067_v46, %v4108_v43 }
 0x1a7   : > { %v894_v51 = vpop.f32.mrb[16].mxu0  ;;  %v1051_v54 = vpop.f32.mrb[16].mxu1 }
 0x1a8   : > { %v4140_v52 = vpack.c.bf16 %v916_v48, %v915_v47  ;;  %v895_v53 = vadd.f32 %v4101_v30, %v894_v51  ;;  %v3038_v55 = vpop.f32.mrb[17].mxu0  ;;  %v4143_v56 = vpack.c.bf16 %v1073_v50, %v1072_v45  ;;  %v1052_v57 = vadd.f32 %v4101_v30, %v1051_v54  ;;  %v3066_v58 = vpop.f32.mrb[17].mxu1 }
 0x1a9   : > { %v897_v59 = vpop.f32.mrb[18].mxu0  ;;  %v1054_v61 = vpop.f32.mrb[18].mxu1  ;;  %v3446_v58 = vld [vmem:[#allocation8 + $0xd0] sm:$0xff]  }
 0x1aa   : > { %925 = vst [vmem:[#allocation2 + $0x30] sm:$0xff] %v4140_v52  ;;  %v911_v31 = vmax.f32 %v895_v53, 0.0  ;;  %v898_v60 = vadd.f32 %v4101_v30, %v897_v59  ;;  %v3039_v43 = vpop.f32.mrb[19].mxu0  ;;  %1082 = vst [vmem:[#allocation2 + $0x48] sm:$0xff] %v4143_v56  ;;  %v1068_v62 = vmax.f32 %v1052_v57, 0.0  ;;  %v1055_v63 = vadd.f32 %v4101_v30, %v1054_v61  ;;  %v3067_v1 = vpop.f32.mrb[19].mxu1  ;;  %3108 = vmatprep.mubr.bf16.mxu1 %v4143_v56 }
 0x1ab   : > { %v1126_v20 = vshll.u32 %v4140_v52, 16  ;;  %v1124_v23 = vshrl.u32 %v4140_v52, 16  ;;  %v1353_v24 = vshll.u32 %v4143_v56, 16  ;;  %v1351_v35 = vshrl.u32 %v4143_v56, 16  ;;  %v3447_v59 = vld [vmem:[#allocation8 + $0x88] sm:$0xff]   ;;  %v3449_v61 = vld [vmem:[#allocation8 + $0x90] sm:$0xff]  }
 0x1ac   : > { %v912_v2 = vmax.f32 %v898_v60, 0.0  ;;  %v1069_v3 = vmax.f32 %v1055_v63, 0.0  ;;  %v917_v5 = vmul.f32 %v911_v31, %v4112_v49  ;;  %v1074_v7 = vmul.f32 %v1068_v62, %v4112_v49  ;;  %v3448_v60 = vld [vmem:[#allocation8 + $0xd8] sm:$0xff]   ;;  %v3450_v43 = vld [vmem:[#allocation8 + $0xe0] sm:$0xff]   ;;  %v3452_v63 = vld [vmem:[#allocation8 + $0xe8] sm:$0xff]  }
 0x1ad   : > { %v1128_v32 = vrot.slane %v1126_v20, 1  ;;  %v1355_v40 = vrot.slane %v1353_v24, 1  ;;  %v3451_v62 = vld [vmem:[#allocation8 + $0x98] sm:$0xff]   ;;  %v3453_v1 = vld [vmem:[#allocation8 + $0xa0] sm:$0xff]  }
 0x1ae   : > { %v918_v6 = vmul.f32 %v912_v2, %v4120_v4  ;;  %v1075_v8 = vmul.f32 %v1069_v3, %v4120_v4  ;;  %v4162_v4 = vld [vmem:[#allocation2 + $0x18] sm:$0xf8]  ;;  %v3455_v2 = vld [vmem:[#allocation8 + $0xa8] sm:$0xff]  }
 0x1af   : > { %v902_v9 = vpop.f32.mrb[20].mxu0  ;;  %v1059_v11 = vpop.f32.mrb[20].mxu1  ;;  %v1488_v21 = vrot.slane %v4162_v4, 3  ;;  %v1129_v50 = vor.u32 %v1128_v32, %v1124_v23  ;;  %v1356_v55 = vor.u32 %v1355_v40, %v1351_v35  ;;  %v1749_v3 = vshrl.u32 %v4162_v4, 16  ;;  %v3459_v20 = vld [vmem:[#allocation8 + $0xb8] sm:$0xff]   ;;  %v3460_v32 = vld [vmem:[#allocation8 + $0x148] sm:$0xff]  }
 0x1b0   : > { %v4155_v10 = vpack.c.bf16 %v918_v6, %v917_v5  ;;  %v3042_v12 = vpop.f32.mrb[21].mxu0  ;;  %v1079_v13 = vpack.c.bf16 %v1075_v8, %v1074_v7  ;;  %v3070_v30 = vpop.f32.mrb[21].mxu1  ;;  %v1752_v5 = vshll.u32 %v4162_v4, 16  ;;  %v1757_v6 = vshrl.u32 %v4129_v19, 16  ;;  %v3456_v8 = vld [vmem:[#allocation8 + $0xf8] sm:$0xff]   ;;  %v3457_v11 = vld [vmem:[#allocation8 + $0xb0] sm:$0xff]  }
 0x1b1   : > { %v905_v14 = vpop.f32.mrb[22].mxu0  ;;  %v1062_v15 = vpop.f32.mrb[22].mxu1  ;;  %v4160_v18 = vld [vmem:[#allocation2 + $0x48] sm:$0xf8]  ;;  %v1490_v45 = vsel %vm1487_vm1, %v1488_v21, %v1489_v22  ;;  %v1760_v7 = vshll.u32 %v4129_v19, 16  ;;  %v1751_v12 = vrot.slane %v1749_v3, 3 }
 0x1b2   : > { %926 = vst [vmem:[#allocation2 + $0x38] sm:$0xff] %v4155_v10  ;;  %1083 = vst [vmem:[#allocation2 + $0x50] sm:$0xff] %v1079_v13  ;;  %v3043_v49 = vpop.f32.mrb[23].mxu0  ;;  %v3071_v0 = vpop.f32.mrb[23].mxu1  ;;  %v2147_v25 = vshrl.u32 %v4160_v18, 16  ;;  %v2150_v26 = vshll.u32 %v4160_v18, 16 }
 0x1b3   : > { %v2155_v28 = vshrl.u32 %v1079_v13, 16  ;;  %v2158_v34 = vshll.u32 %v1079_v13, 16  ;;  %v1592_v9 = vld [vmem:[#allocation2] sm:$0xf8]  ;;  %v1754_v13 = vrot.slane %v1752_v5, 4  ;;  %v1759_v30 = vrot.slane %v1757_v6, 3 }
 0x1b4   : > { %v2149_v33 = vrot.slane %v2147_v25, 3  ;;  %v2152_v38 = vrot.slane %v2150_v26, 4  ;;  %v1762_v14 = vrot.slane %v1760_v7, 4  ;;  %v1613_v15 = vshrl.u32 %v1592_v9, 16  ;;  %v3458_v19 = vld [vmem:[#allocation8 + $0x140] sm:$0xff]   ;;  %v3465_v40 = vld [vmem:[#allocation8 + $0x110] sm:$0xff]  }
 0x1b5   : > { %v2157_v39 = vrot.slane %v2155_v28, 3  ;;  %v2160_v48 = vrot.slane %v2158_v34, 4  ;;  %v1616_v49 = vshll.u32 %v1592_v9, 16  ;;  %v1621_v0 = vshrl.u32 %v4127_v16, 16  ;;  %v3478_v5 = vld [vmem:[#allocation8 + $0x1d0] sm:$0xff]   ;;  %v3479_v6 = vld [vmem:[#allocation8 + $0x188] sm:$0xff]  }
 0x1b6   : > { %v2153_v47 = vor.u32 %v2152_v38, %v2149_v33  ;;  %v1624_v4 = vshll.u32 %v4127_v16, 16  ;;  %v1755_v21 = vor.u32 %v1754_v13, %v1751_v12  ;;  %v4197_v23 = vor.u32 %v1762_v14, %v1759_v30  ;;  %v3461_v33 = vld [vmem:[#allocation8 + $0x100] sm:$0xff]   ;;  %v3462_v38 = vld [vmem:[#allocation8 + $0x150] sm:$0xff]   ;;  %v3484_v12 = vld [vmem:[#allocation8 + $0x1e8] sm:$0xff]  }
 0x1b7   : > { %v4181_v54 = vor.u32 %v2160_v48, %v2157_v39  ;;  %v1615_v24 = vrot.slane %v1613_v15, 3  ;;  %v1618_v25 = vrot.slane %v1616_v49, 4  ;;  %v1623_v26 = vrot.slane %v1621_v0, 3  ;;  %v3463_v39 = vld [vmem:[#allocation8 + $0x108] sm:$0xff]   ;;  %v3481_v9 = vld [vmem:[#allocation8 + $0x190] sm:$0xff]   ;;  %v3485_v13 = vld [vmem:[#allocation8 + $0x1a0] sm:$0xff]  }
 0x1b8   : > { %v1626_v28 = vrot.slane %v1624_v4, 4  ;;  %v1764_v16 = vsel %vm1611_vm3, %v1755_v21, %v4197_v23  ;;  %v3471_v48 = vld [vmem:[#allocation8 + $0x128] sm:$0xff]   ;;  %v3486_v30 = vld [vmem:[#allocation8 + $0x1f0] sm:$0xff]   ;;  %v3488_v15 = vld [vmem:[#allocation8 + $0x1f8] sm:$0xff]  }
 0x1b9   : > { %v1104_v37 = vld [vmem:[#allocation2 + $0x38] sm:$0x1f]  ;;  %v1086_v41 = vld [vmem:[#allocation2 + $0x50] sm:$0xf]  ;;  %v1619_v35 = vor.u32 %v1618_v25, %v1615_v24  ;;  %v3487_v14 = vld [vmem:[#allocation8 + $0x1a8] sm:$0xff]  }
 0x1ba   : > { %v1131_v42 = vshll.u32 %v1104_v37, 16  ;;  %v4172_v44 = vld [vmem:[#allocation2 + $0x50] sm:$0x1f]  ;;  %3109 = vmatmul.mubr.bf16.vlgmr.msra.gmra.mrb[24].mxu1 %v1086_v41  ;;  %v1135_v52 = vshrl.u32 %v1104_v37, 16  ;;  %v3466_v41 = vld [vmem:[#allocation8 + $0x160] sm:$0xff]   ;;  %v3490_v0 = vld [vmem:[#allocation8 + $0x1b8] sm:$0xff]  }
 0x1bb   : > { %v1358_v46 = vshll.u32 %v4172_v44, 16  ;;  %3133 = vmatpush3.bf16.msra.mxu1 %v4092_v27  ;;  %3148 = vmatprep.mubr.bf16.mxu1 %v1490_v45  ;;  %v4186_v27 = vsel %vm1611_vm3, %v2153_v47, %v4181_v54  ;;  %v1362_v34 = vshrl.u32 %v4172_v44, 16  ;;  %v3468_v44 = vld [vmem:[#allocation8 + $0x168] sm:$0xff]   ;;  %v3469_v45 = vld [vmem:[#allocation8 + $0x120] sm:$0xff]   ;;  %v3470_v47 = vld [vmem:[#allocation8 + $0x170] sm:$0xff]  }
 0x1bc   : > { %v1133_v51 = vrot.slane %v1131_v42, 1  ;;  %3134 = vmatprep.subr.bf16.mxu1 %v3444_v36  ;;  %v3467_v42 = vld [vmem:[#allocation8 + $0x118] sm:$0xff]   ;;  %v3489_v49 = vld [vmem:[#allocation8 + $0x1b0] sm:$0xff]   ;;  %v3491_v4 = vld [vmem:[#allocation8 + $0x200] sm:$0xff]  }
 0x1bd   : > { %v4179_v53 = vrot.slane %v1358_v46, 1  ;;  %v1991_v46 = vld [vmem:[#allocation2 + $0x30] sm:$0xf8]  ;;  %v3494_v21 = vld [vmem:[#allocation8 + $0x218] sm:$0xff]   ;;  %v3496_v24 = vld [vmem:[#allocation8 + $0x228] sm:$0xff]  }
 0x1be   : > { %v1134_v56 = vsel %vm1122_vm2, %v1129_v50, %v1133_v51  ;;  %v1137_v57 = vor.u32 %v1135_v52, %v1133_v51  ;;  %v2011_v50 = vshrl.u32 %v1991_v46, 16  ;;  %v2014_v51 = vshll.u32 %v1991_v46, 16  ;;  %v3497_v25 = vld [vmem:[#allocation8 + $0x230] sm:$0xff]  }
 0x1bf   : > { %3088 = vmatprep.mubr.bf16.mxu0 %v1134_v56  ;;  %3135 = vmatpush3.bf16.msra.mxu1 %v3444_v36  ;;  %v1361_v31 = vsel %vm1122_vm2, %v1356_v55, %v4179_v53  ;;  %v4204_v36 = vor.u32 %v1626_v28, %v1623_v26  ;;  %v1364_v37 = vor.u32 %v1362_v34, %v4179_v53  ;;  %v2019_v52 = vshrl.u32 %v4155_v10, 16  ;;  %v3472_v55 = vld [vmem:[#allocation8 + $0x178] sm:$0xff]   ;;  %v3473_v56 = vld [vmem:[#allocation8 + $0x130] sm:$0xff]   ;;  %v3500_v28 = vld [vmem:[#allocation9 + $0x8] sm:$0xff]  }
 0x1c0   : > { %3089 = vmatmul.mubr.bf16.vlgmr.msra.gmra.mrb[24].mxu0 %v1137_v57  ;;  %3136 = vmatprep.subr.bf16.mxu1 %v3446_v58  ;;  %v2022_v53 = vshll.u32 %v4155_v10, 16  ;;  %v2013_v57 = vrot.slane %v2011_v50, 3  ;;  %v3476_v10 = vld [vmem:[#allocation8 + $0x1c8] sm:$0xff]   ;;  %v3498_v26 = vld [vmem:[#allocation8 + $0x238] sm:$0xff]  }
 0x1c1   : > { %3113 = vmatpush3.bf16.msra.mxu0 %v4095_v29  ;;  %3128 = vmatprep.mubr.bf16.mxu0 %v1361_v31  ;;  %v3454_v29 = vld [vmem:[#allocation8 + $0xf0] sm:$0xff]   ;;  %v1628_v17 = vsel %vm1611_vm3, %v1619_v35, %v4204_v36  ;;  %v3504_v34 = vld [vmem:[#allocation9 + $0x28] sm:$0xff]  }
 0x1c2   : > { %3114 = vmatprep.subr.bf16.mxu0 %v3447_v59  ;;  %v2024_v31 = vrot.slane %v2022_v53, 4  ;;  %v2279_v35 = vld [vmem:[%s3980_s12 + $0x7] sm:$0xff] }
 0x1c3   : > { %3137 = vmatpush3.bf16.msra.mxu1 %v3446_v58  ;;  %v2016_v58 = vrot.slane %v2014_v51, 4 }
 0x1c4   : > { %3138 = vmatprep.subr.bf16.mxu1 %v3448_v60 }
 0x1c5   : > { %3115 = vmatpush3.bf16.msra.mxu0 %v3447_v59  ;;  %v2021_v59 = vrot.slane %v2019_v52, 3 }
 0x1c6   : > { %3116 = vmatprep.subr.bf16.mxu0 %v3449_v61 }
 0x1c7   : > { %3139 = vmatpush3.bf16.msra.mxu1 %v3448_v60  ;;  %v3474_v60 = vld [vmem:[#allocation8 + $0x1c0] sm:$0xff]  }
 0x1c8   : > { %3140 = vmatprep.subr.bf16.mxu1 %v3450_v43 }
 0x1c9   : > { %3117 = vmatpush3.bf16.msra.mxu0 %v3449_v61  ;;  %v3475_v61 = vld [vmem:[#allocation8 + $0x138] sm:$0xff]  }
 0x1ca   : > { %3118 = vmatprep.subr.bf16.mxu0 %v3451_v62 }
 0x1cb   : > { %3141 = vmatpush3.bf16.msra.mxu1 %v3450_v43  ;;  %v2017_v43 = vor.u32 %v2016_v58, %v2013_v57  ;;  %v3512_v58 = vld [vmem:[%s4311_s6 + $0x28] sm:$0xff]  }
 0x1cc   : > { %3142 = vmatprep.subr.bf16.mxu1 %v3452_v63 }
 0x1cd   : > { %3119 = vmatpush3.bf16.msra.mxu0 %v3451_v62  ;;  %v2025_v62 = vor.u32 %v2024_v31, %v2021_v59  ;;  %v3513_v59 = vld [vmem:[%s4311_s6 + $0x30] sm:$0xff]   ;;  %v3514_v31 = vld [vmem:[%s4311_s6 + $0x38] sm:$0xff]  }
 0x1ce   : > { %3120 = vmatprep.subr.bf16.mxu0 %v3453_v1 }
 0x1cf   : > { %3143 = vmatpush3.bf16.msra.mxu1 %v3452_v63  ;;  %v1867_v63 = vld [vmem:[#allocation2 + $0x50] sm:$0x7f] }
 0x1d0   : > { %3144 = vmatprep.subr.bf16.mxu1 %v3454_v29  ;;  %v1888_v3 = vrot.slane %v1867_v63, 3 }
 0x1d1   : > { %3121 = vmatpush3.bf16.msra.mxu0 %v3453_v1  ;;  %v3477_v1 = vld [vmem:[#allocation8 + $0x180] sm:$0xff]  }
 0x1d2   : > { %3122 = vmatprep.subr.bf16.mxu0 %v3455_v2 }
 0x1d3   : > { %3145 = vmatpush3.bf16.msra.mxu1 %v3454_v29  ;;  %v2026_v29 = vsel %vm1611_vm3, %v2017_v43, %v2025_v62 }
 0x1d4   : > { %3146 = vmatprep.subr.bf16.mxu1 %v3456_v8 }
 0x1d5   : > { %3123 = vmatpush3.bf16.msra.mxu0 %v3455_v2  ;;  %v1887_v2 = vrot.slane %v4160_v18, 3  ;;  %v3482_v18 = vld [vmem:[#allocation8 + $0x1e0] sm:$0xff]  }
 0x1d6   : > { %3124 = vmatprep.subr.bf16.mxu0 %v3457_v11 }
 0x1d7   : > { %3147 = vmatpush3.bf16.msra.mxu1 %v3456_v8  ;;  %v1889_v7 = vsel %vm1487_vm1, %v1887_v2, %v1888_v3  ;;  %v3480_v8 = vld [vmem:[#allocation8 + $0x1d8] sm:$0xff]  }
 0x1d8   : > { %3172 = vmatprep.subr.bf16.mxu1 %v3458_v19 }
 0x1d9   : > { %3125 = vmatpush3.bf16.msra.mxu0 %v3457_v11  ;;  %v3483_v11 = vld [vmem:[#allocation8 + $0x198] sm:$0xff]  }
 0x1da   : > { %3126 = vmatprep.subr.bf16.mxu0 %v3459_v20  ;;  %3149 = vmatmul.mubr.bf16.vlgmr.msra.gmra.mrb[28].mxu1 %v1489_v22  ;;  %v3464_v22 = vld [vmem:[#allocation8 + $0x158] sm:$0xff]  }
 0x1db   : > { %3173 = vmatpush3.bf16.msra.mxu1 %v3458_v19  ;;  %3188 = vmatprep.mubr.bf16.mxu1 %v1764_v16  ;;  %v3492_v19 = vld [vmem:[#allocation8 + $0x208] sm:$0xff]   ;;  %v3503_v16 = vld [vmem:[#allocation9 + $0x20] sm:$0xff]  }
 0x1dc   : > { %3174 = vmatprep.subr.bf16.mxu1 %v3460_v32 }
 0x1dd   : > { %3127 = vmatpush3.bf16.msra.mxu0 %v3459_v20  ;;  %v3493_v20 = vld [vmem:[#allocation8 + $0x210] sm:$0xff]  }
 0x1de   : > { %3152 = vmatprep.subr.bf16.mxu0 %v3461_v33 }
 0x1df   : > { %3175 = vmatpush3.bf16.msra.mxu1 %v3460_v32  ;;  %v3501_v32 = vld [vmem:[#allocation9 + $0x10] sm:$0xff]  }
 0x1e0   : > { %3129 = vmatmul.mubr.bf16.vlgmr.msra.gmra.mrb[28].mxu0 %v1364_v37  ;;  %3176 = vmatprep.subr.bf16.mxu1 %v3462_v38  ;;  %v3506_v37 = vld [vmem:[#allocation9 + $0x38] sm:$0xff]  }
 0x1e1   : > { %3153 = vmatpush3.bf16.msra.mxu0 %v3461_v33  ;;  %3168 = vmatprep.mubr.bf16.mxu0 %v1628_v17  ;;  %v3502_v33 = vld [vmem:[#allocation9 + $0x18] sm:$0xff]   ;;  %v3507_v17 = vld [vmem:[%s4311_s6] sm:$0xff]  }
 0x1e2   : > { %3154 = vmatprep.subr.bf16.mxu0 %v3463_v39 }
 0x1e3   : > { %3177 = vmatpush3.bf16.msra.mxu1 %v3462_v38 }
 0x1e4   : > { %3178 = vmatprep.subr.bf16.mxu1 %v3464_v22 }
 0x1e5   : > { %3155 = vmatpush3.bf16.msra.mxu0 %v3463_v39  ;;  %v2281_v39 = vld [vmem:[%s3980_s12 + $0x17] sm:$0xff] }
 0x1e6   : > { %3156 = vmatprep.subr.bf16.mxu0 %v3465_v40 }
 0x1e7   : > { %3179 = vmatpush3.bf16.msra.mxu1 %v3464_v22  ;;  %v2283_v22 = vpack.c.bf16 %v2281_v39, %v2281_v39  ;;  %v2784_v39 = vld [vmem:[%s4310_s5] ss:$0 sm:$0xff] }
 0x1e8   : > { %3180 = vmatprep.subr.bf16.mxu1 %v3466_v41 }
 0x1e9   : > { %3157 = vmatpush3.bf16.msra.mxu0 %v3465_v40  ;;  %v3508_v40 = vld [vmem:[%s4311_s6 + $0x8] sm:$0xff]  }
 0x1ea   : > { %3158 = vmatprep.subr.bf16.mxu0 %v3467_v42 }
 0x1eb   : > { %3181 = vmatpush3.bf16.msra.mxu1 %v3466_v41  ;;  %v3509_v41 = vld [vmem:[%s4311_s6 + $0x10] sm:$0xff]  }
 0x1ec   : > { %3182 = vmatprep.subr.bf16.mxu1 %v3468_v44 }
 0x1ed   : > { %3159 = vmatpush3.bf16.msra.mxu0 %v3467_v42  ;;  %v3510_v42 = vld [vmem:[%s4311_s6 + $0x18] sm:$0xff]  }
 0x1ee   : > { %3160 = vmatprep.subr.bf16.mxu0 %v3469_v45 }
 0x1ef   : > { %3183 = vmatpush3.bf16.msra.mxu1 %v3468_v44  ;;  %v3511_v44 = vld [vmem:[%s4311_s6 + $0x20] sm:$0xff]  }
 0x1f0   : > { %3184 = vmatprep.subr.bf16.mxu1 %v3470_v47 }
 0x1f1   : > { %3161 = vmatpush3.bf16.msra.mxu0 %v3469_v45 }
 0x1f2   : > { %3162 = vmatprep.subr.bf16.mxu0 %v3471_v48 }
 0x1f3   : > { %3185 = vmatpush3.bf16.msra.mxu1 %v3470_v47 }
 0x1f4   : > { %3186 = vmatprep.subr.bf16.mxu1 %v3472_v55 }
 0x1f5   : > { %3163 = vmatpush3.bf16.msra.mxu0 %v3471_v48 }
 0x1f6   : > { %3164 = vmatprep.subr.bf16.mxu0 %v3473_v56 }
 0x1f7   : > { %3187 = vmatpush3.bf16.msra.mxu1 %v3472_v55 }
 0x1f8   : > { %3212 = vmatprep.subr.bf16.mxu1 %v3474_v60 }
 0x1f9   : > { %3165 = vmatpush3.bf16.msra.mxu0 %v3473_v56 }
 0x1fa   : > { %3166 = vmatprep.subr.bf16.mxu0 %v3475_v61  ;;  %3189 = vmatmul.mubr.bf16.vlgmr.msra.gmra.mrb[32].mxu1 %v4197_v23  ;;  %v3495_v23 = vld [vmem:[#allocation8 + $0x220] sm:$0xff]  }
 0x1fb   : > { %3213 = vmatpush3.bf16.msra.mxu1 %v3474_v60  ;;  %3228 = vmatprep.mubr.bf16.mxu1 %v2026_v29 }
 0x1fc   : > { %3214 = vmatprep.subr.bf16.mxu1 %v3476_v10 }
 0x1fd   : > { %3167 = vmatpush3.bf16.msra.mxu0 %v3475_v61 }
 0x1fe   : > { %3192 = vmatprep.subr.bf16.mxu0 %v3477_v1 }
 0x1ff   : > { %3215 = vmatpush3.bf16.msra.mxu1 %v3476_v10 }
 0x200   : > { %3169 = vmatmul.mubr.bf16.vlgmr.msra.gmra.mrb[32].mxu0 %v4204_v36  ;;  %3216 = vmatprep.subr.bf16.mxu1 %v3478_v5  ;;  %v2280_v36 = vld [vmem:[%s3980_s12 + $0xf] sm:$0xff]  ;;  %s3635_s12 = scalar_lea.vmem %s3634_s28, 768 }
 0x201   : > { %3193 = vmatpush3.bf16.msra.mxu0 %v3477_v1  ;;  %3208 = vmatprep.mubr.bf16.mxu0 %v1889_v7  ;;  %v2282_v38 = vpack.c.bf16 %v2280_v36, %v2279_v35  ;;  %p3637_p1 = scmp.lt.s32.totalorder %s3635_s12, %s3629_s23 }
 0x202   : > { %3194 = vmatprep.subr.bf16.mxu0 %v3479_v6 }
 0x203   : > { %3217 = vmatpush3.bf16.msra.mxu1 %v3478_v5  ;;  %p3638_p2 = por %p3637_p1, %p3636_p12 }
 0x204   : > { %3218 = vmatprep.subr.bf16.mxu1 %v3480_v8 }
 0x205   : > { %3195 = vmatpush3.bf16.msra.mxu0 %v3479_v6  ;;  %p3639_p4 = pnand %p3638_p2, %p3632_p7 }
 0x206   : > { %3196 = vmatprep.subr.bf16.mxu0 %v3481_v9 }
 0x207   : > { %3219 = vmatpush3.bf16.msra.mxu1 %v3480_v8 }
 0x208   : > { %3220 = vmatprep.subr.bf16.mxu1 %v3482_v18 }
 0x209   : > { %3197 = vmatpush3.bf16.msra.mxu0 %v3481_v9 }
 0x20a   : > { %3198 = vmatprep.subr.bf16.mxu0 %v3483_v11 }
 0x20b   : > { %3221 = vmatpush3.bf16.msra.mxu1 %v3482_v18 }
 0x20c   : > { %3222 = vmatprep.subr.bf16.mxu1 %v3484_v12 }
 0x20d   : > { %3199 = vmatpush3.bf16.msra.mxu0 %v3483_v11 }
 0x20e   : > { %3200 = vmatprep.subr.bf16.mxu0 %v3485_v13 }
 0x20f   : > { %3223 = vmatpush3.bf16.msra.mxu1 %v3484_v12 }
 0x210   : > { %3224 = vmatprep.subr.bf16.mxu1 %v3486_v30 }
 0x211   : > { %3201 = vmatpush3.bf16.msra.mxu0 %v3485_v13 }
 0x212   : > { %3202 = vmatprep.subr.bf16.mxu0 %v3487_v14 }
 0x213   : > { %3225 = vmatpush3.bf16.msra.mxu1 %v3486_v30 }
 0x214   : > { %3226 = vmatprep.subr.bf16.mxu1 %v3488_v15 }
 0x215   : > { %3203 = vmatpush3.bf16.msra.mxu0 %v3487_v14 }
 0x216   : > { %3204 = vmatprep.subr.bf16.mxu0 %v3489_v49 }
 0x217   : > { %3227 = vmatpush3.bf16.msra.mxu1 %v3488_v15 }
 0x219   : > { %3205 = vmatpush3.bf16.msra.mxu0 %v3489_v49 }
 0x21a   : > { %3206 = vmatprep.subr.bf16.mxu0 %v3490_v0  ;;  %3229 = vmatmul.mubr.bf16.vlgmr.msra.gmra.mrb[36].mxu1 %v2025_v62 }
 0x21b   : > { %3268 = vmatprep.mubr.bf16.mxu1 %v2282_v38 }
 0x21d   : > { %3207 = vmatpush3.bf16.msra.mxu0 %v3490_v0 }
 0x21e   : > { %3232 = vmatprep.subr.bf16.mxu0 %v3491_v4 }
 0x220   : > { %3209 = vmatmul.mubr.bf16.vlgmr.msra.gmra.mrb[36].mxu0 %v1888_v3 }
 0x221   : > { %3233 = vmatpush3.bf16.msra.mxu0 %v3491_v4  ;;  %3248 = vmatprep.mubr.bf16.mxu0 %v4186_v27  ;;  %v3499_v27 = vld [vmem:[#allocation9] sm:$0xff]  }
 0x222   : > { %3234 = vmatprep.subr.bf16.mxu0 %v3492_v19  ;;  %3252 = vmatprep.subr.bf16.mxu1 %v3499_v27 }
 0x223   : > { %3253 = vmatpush3.bf16.msra.mxu1 %v3499_v27 }
 0x224   : > { %3254 = vmatprep.subr.bf16.mxu1 %v3500_v28 }
 0x225   : > { %3235 = vmatpush3.bf16.msra.mxu0 %v3492_v19 }
 0x226   : > { %3236 = vmatprep.subr.bf16.mxu0 %v3493_v20 }
 0x227   : > { %3255 = vmatpush3.bf16.msra.mxu1 %v3500_v28 }
 0x228   : > { %3256 = vmatprep.subr.bf16.mxu1 %v3501_v32 }
 0x229   : > { %3237 = vmatpush3.bf16.msra.mxu0 %v3493_v20 }
 0x22a   : > { %3238 = vmatprep.subr.bf16.mxu0 %v3494_v21 }
 0x22b   : > { %3257 = vmatpush3.bf16.msra.mxu1 %v3501_v32 }
 0x22c   : > { %3258 = vmatprep.subr.bf16.mxu1 %v3502_v33 }
 0x22d   : > { %3239 = vmatpush3.bf16.msra.mxu0 %v3494_v21 }
 0x22e   : > { %3240 = vmatprep.subr.bf16.mxu0 %v3495_v23 }
 0x22f   : > { %3259 = vmatpush3.bf16.msra.mxu1 %v3502_v33 }
 0x230   : > { %3260 = vmatprep.subr.bf16.mxu1 %v3503_v16 }
 0x231   : > { %3241 = vmatpush3.bf16.msra.mxu0 %v3495_v23 }
 0x232   : > { %3242 = vmatprep.subr.bf16.mxu0 %v3496_v24 }
 0x233   : > { %3261 = vmatpush3.bf16.msra.mxu1 %v3503_v16 }
 0x234   : > { %3262 = vmatprep.subr.bf16.mxu1 %v3504_v34 }
 0x235   : > { %3243 = vmatpush3.bf16.msra.mxu0 %v3496_v24 }
 0x236   : > { %3244 = vmatprep.subr.bf16.mxu0 %v3497_v25 }
 0x237   : > { %3263 = vmatpush3.bf16.msra.mxu1 %v3504_v34 }
 0x239   : > { %3245 = vmatpush3.bf16.msra.mxu0 %v3497_v25 }
 0x23a   : > { %3246 = vmatprep.subr.bf16.mxu0 %v3498_v26 }
 0x23d   : > { %3247 = vmatpush3.bf16.msra.mxu0 %v3498_v26 }
 0x240   : > { %3249 = vmatmul.mubr.bf16.vlgmr.msra.gmra.mrb[40].mxu0 %v4181_v54  ;;  %v3505_v54 = vld [vmem:[#allocation9 + $0x30] sm:$0xff]  }
 0x241   : > { %3264 = vmatprep.subr.bf16.mxu1 %v3505_v54 }
 0x242   : > { %3265 = vmatpush3.bf16.msra.mxu1 %v3505_v54 }
 0x243   : > { %3266 = vmatprep.subr.bf16.mxu1 %v3506_v37 }
 0x246   : > { %3267 = vmatpush3.bf16.msra.mxu1 %v3506_v37 }
 0x247   : > { %3272 = vmatprep.subr.bf16.mxu1 %v3507_v17 }
 0x249   : > { %3269 = vmatmul.mubr.bf16.vlgmr.msra.gmra.mrb[40].mxu1 %v2283_v22 }
 0x24a   : > { %3273 = vmatpush3.bf16.msra.mxu1 %v3507_v17 }
 0x24b   : > { %3274 = vmatprep.subr.bf16.mxu1 %v3508_v40 }
 0x24e   : > { %3275 = vmatpush3.bf16.msra.mxu1 %v3508_v40 }
 0x24f   : > { %3276 = vmatprep.subr.bf16.mxu1 %v3509_v41 }
 0x252   : > { %3277 = vmatpush3.bf16.msra.mxu1 %v3509_v41 }
 0x253   : > { %3278 = vmatprep.subr.bf16.mxu1 %v3510_v42 }
 0x256   : > { %3279 = vmatpush3.bf16.msra.mxu1 %v3510_v42 }
 0x257   : > { %3280 = vmatprep.subr.bf16.mxu1 %v3511_v44 }
 0x25a   : > { %3281 = vmatpush3.bf16.msra.mxu1 %v3511_v44 }
 0x25b   : > { %3282 = vmatprep.subr.bf16.mxu1 %v3512_v58 }
 0x25e   : > { %3283 = vmatpush3.bf16.msra.mxu1 %v3512_v58 }
 0x25f   : > { %3284 = vmatprep.subr.bf16.mxu1 %v3513_v59 }
 0x262   : > { %3285 = vmatpush3.bf16.msra.mxu1 %v3513_v59 }
 0x263   : > { %3286 = vmatprep.subr.bf16.mxu1 %v3514_v31 }
 0x266   : > { %3287 = vmatpush3.bf16.msra.mxu1 %v3514_v31 }
 0x28d   : > { %v3110_v45 = vpop.f32.mrb[24].mxu1 }
 0x28e   : > { %v1318_v46 = vpop.f32.mrb[25].mxu1 }
 0x28f   : > { %v3111_v47 = vpop.f32.mrb[26].mxu1 }
 0x290   : > { %v1321_v48 = vpop.f32.mrb[27].mxu1 }
 0x293   : > { %v3090_v50 = vpop.f32.mrb[24].mxu0 }
 0x294   : > { %v1327_v51 = vadd.f32 %v3110_v45, %v3090_v50  ;;  %v1222_v52 = vpop.f32.mrb[25].mxu0 }
 0x295   : > { %v1319_v53 = vadd.f32 %v1318_v46, %v1222_v52  ;;  %v3091_v55 = vpop.f32.mrb[26].mxu0 }
 0x296   : > { %v1225_v56 = vpop.f32.mrb[27].mxu0  ;;  %v2785_v55 = vld [vmem:[%s4314_s9] ss:$0 sm:$0xff] }
 0x297   : > { %v1322_v57 = vadd.f32 %v1321_v48, %v1225_v56  ;;  %v2794_v56 = vld [vmem:[%s4340_s7] ss:$0 sm:$0xff] }
 0x298   : > { %v3296_v58 = vadd.f32 %v2794_v56, %v2785_v55 }
 0x2ad   : > { %v3150_v60 = vpop.f32.mrb[28].mxu1 }
 0x2ae   : > { %v1575_v61 = vpop.f32.mrb[29].mxu1 }
 0x2af   : > { %v3151_v43 = vpop.f32.mrb[30].mxu1 }
 0x2b0   : > { %v1578_v62 = vpop.f32.mrb[31].mxu1 }
 0x2b3   : > { %v3130_v10 = vpop.f32.mrb[28].mxu0 }
 0x2b4   : > { %v1465_v63 = vadd.f32 %v3130_v10, %v1327_v51  ;;  %v1449_v1 = vpop.f32.mrb[29].mxu0 }
 0x2b5   : > { %v1463_v29 = vadd.f32 %v1449_v1, %v1319_v53  ;;  %v3131_v2 = vpop.f32.mrb[30].mxu0 }
 0x2b6   : > { %v1452_v3 = vpop.f32.mrb[31].mxu0  ;;  %v1591_v5 = vadd.f32 %v3150_v60, %v1465_v63 }
 0x2b7   : > { %v1464_v6 = vadd.f32 %v1452_v3, %v1322_v57  ;;  %v1589_v7 = vadd.f32 %v1575_v61, %v1463_v29 }
 0x2b9   : > { %v1590_v8 = vadd.f32 %v1578_v62, %v1464_v6 }
 0x2cd   : > { %v3190_v9 = vpop.f32.mrb[32].mxu1 }
 0x2ce   : > { %v1849_v18 = vpop.f32.mrb[33].mxu1 }
 0x2cf   : > { %v3191_v11 = vpop.f32.mrb[34].mxu1 }
 0x2d0   : > { %v1852_v12 = vpop.f32.mrb[35].mxu1 }
 0x2d3   : > { %v3170_v13 = vpop.f32.mrb[32].mxu0 }
 0x2d4   : > { %v1729_v30 = vadd.f32 %v3170_v13, %v1591_v5  ;;  %v1713_v14 = vpop.f32.mrb[33].mxu0 }
 0x2d5   : > { %v1727_v15 = vadd.f32 %v1713_v14, %v1589_v7  ;;  %v3171_v49 = vpop.f32.mrb[34].mxu0 }
 0x2d6   : > { %v1716_v0 = vpop.f32.mrb[35].mxu0  ;;  %v1865_v4 = vadd.f32 %v3190_v9, %v1729_v30 }
 0x2d7   : > { %v1728_v19 = vadd.f32 %v1716_v0, %v1590_v8  ;;  %v1863_v20 = vadd.f32 %v1849_v18, %v1727_v15 }
 0x2d9   : > { %v1864_v21 = vadd.f32 %v1852_v12, %v1728_v19 }
 0x2ed   : > { %v3230_v23 = vpop.f32.mrb[36].mxu1 }
 0x2ee   : > { %v2111_v24 = vpop.f32.mrb[37].mxu1 }
 0x2ef   : > { %v3231_v25 = vpop.f32.mrb[38].mxu1 }
 0x2f0   : > { %v2114_v26 = vpop.f32.mrb[39].mxu1 }
 0x2f3   : > { %v3210_v27 = vpop.f32.mrb[36].mxu0 }
 0x2f4   : > { %v1990_v28 = vadd.f32 %v3210_v27, %v1865_v4  ;;  %v1974_v32 = vpop.f32.mrb[37].mxu0 }
 0x2f5   : > { %v1988_v33 = vadd.f32 %v1974_v32, %v1863_v20  ;;  %v3211_v16 = vpop.f32.mrb[38].mxu0 }
 0x2f6   : > { %v1977_v34 = vpop.f32.mrb[39].mxu0  ;;  %v2127_v54 = vadd.f32 %v3230_v23, %v1990_v28 }
 0x2f7   : > { %v1989_v35 = vadd.f32 %v1977_v34, %v1864_v21  ;;  %v2125_v36 = vadd.f32 %v2111_v24, %v1988_v33 }
 0x2f9   : > { %v2126_v37 = vadd.f32 %v2114_v26, %v1989_v35 }
 0x313   : > { %v3250_v38 = vpop.f32.mrb[40].mxu0 }
 0x314   : > { %v2263_v17 = vadd.f32 %v3250_v38, %v2127_v54  ;;  %v2247_v22 = vpop.f32.mrb[41].mxu0 }
 0x315   : > { %v2261_v40 = vadd.f32 %v2247_v22, %v2125_v36  ;;  %v3251_v41 = vpop.f32.mrb[42].mxu0 }
 0x316   : > { %v2273_v42 = vadd.f32 %v2784_v39, %v2263_v17  ;;  %v2250_v44 = vpop.f32.mrb[43].mxu0 }
 0x317   : > { %v2271_v45 = vadd.f32 %v2784_v39, %v2261_v40  ;;  %v2262_v46 = vadd.f32 %v2250_v44, %v2126_v37 }
 0x318   : > { %v2276_v48 = vmax.f32 %v2273_v42, 0.0 }
 0x319   : > { %v2272_v47 = vadd.f32 %v2784_v39, %v2262_v46  ;;  %v2274_v50 = vmax.f32 %v2271_v45, 0.0 }
 0x31a   : > { %v2278_v53 = vpack.c.bf16 %v2276_v48, %v2276_v48 }
 0x31b   : > { %v2275_v51 = vmax.f32 %v2272_v47, 0.0 }
 0x31d   : > { %v2277_v52 = vpack.c.bf16 %v2275_v51, %v2274_v50 }
 0x31f   : > { %3288 = vmatprep.mubr.bf16.mxu1 %v2277_v52 }
 0x320   : > { %3289 = vmatmul.mubr.bf16.vlgmr.msra.gmra.mrb[40].mxu1 %v2278_v53 }
 0x3f3   : > { %v3290_v57 = vpop.f32.mrb[40].mxu1 }
 0x3f4   : > { %v3292_v59 = vadd.f32 %v3290_v57, %v2785_v55  ;;  %v2508_v31 = vpop.f32.mrb[41].mxu1 }
 0x3f5   : > { %v3294_v60 = vadd.f32 %v2785_v55, %v2508_v31  ;;  %v3291_v61 = vpop.f32.mrb[42].mxu1 }
 0x3f6   : > { %v3293_v43 = vadd.f32 %v3292_v59, %v2794_v56  ;;  %v2511_v62 = vpop.f32.mrb[43].mxu1 }
 0x3f7   : > { %v3295_v10 = vadd.f32 %v3294_v60, %v2794_v56  ;;  %v3297_v63 = vadd.f32 %v3296_v58, %v2511_v62 }
 0x3f8   : > { %v2527_v1 = vmax.f32 %v3293_v43, 0.0 }
 0x3f9   : > { %v2525_v29 = vmax.f32 %v3295_v10, 0.0  ;;  %v2526_v2 = vmax.f32 %v3297_v63, 0.0 }
 0x3fa   : > { %2530 = vst [vmem:[%s421_s10 + $0x10] sm:$0xff] %v2527_v1 }
 0x3fb   : > { %2528 = vst [vmem:[%s421_s10] sm:$0xff] %v2525_v29  ;;  %2529 = vst [vmem:[%s421_s10 + $0x8] sm:$0xff] %v2526_v2 }
 0x3fc   : > { %3642 = shalt.err (!%p3639_p4)
}
 0x3fd   : > { %s3643_s29 = scalar_lea.hbm %s4261_s27, 384  ;;  %s3647_s10 = scalar_lea.hbm %s4341_s25, 768 }
 0x3fe   : > { %p3644_p9 = scmp.ne.s32.totalorder %s4261_s27, %s3643_s29  ;;  %p3648_p8 = scmp.lt.u32.totalorder %s4261_s27, %s4341_s25 }
 0x3ff   : > { %p3649_p13 = scmp.lt.u32.totalorder %s3647_s10, %s3643_s29  ;;  %p3651_p10 = scmp.lt.u32.totalorder %s3643_s29, %s4261_s27 }
 0x400   : > { %p3645_p0 = pnand %p3644_p9, %p3928_p5 }
 0x401   : > { %p3650_p6 = por %p3649_p13, %p3648_p8 }
 0x402   : > { %p3646_p11 = pneg %p3645_p0 }
 0x403   : > { %p3652_p3 = por %p3651_p10, %p3650_p6 }
 0x405   : > { %p3653_p7 = pnand %p3652_p3, %p3646_p11 }
 0x407   : > { %3656 = shalt.err (!%p3653_p7)
}
 0x408   : > { %s3717_s21 = smov 128   ;;  %s3718_s23 = smov 8  }
 0x409   : > { %3321 = dma.vmem_to_hbm [thread:$0]  (%p3928_p5), %s4256_s30, 384, %s4261_s27, %s2532_s17, %s3717_s21, %s3717_s21, %s3718_s23  }
 0x40a PF: > { %s4342_s26 = sld [smem:[#allocation16_spill]]  ;;  %s4343_s28 = sld [smem:[#allocation17_spill]] }
 0x40b   : > { %p4345_p1 = scmp.ge.s32.totalorder %s3703_s16, 2 }
 0x410   : > { %s2560_s12 = sand.u32 1, %s4342_s26   ;;  %p4344_p12 = scmp.ne.s32.totalorder %s4343_s28, 0 }
 0x411   : > { %s2561_s29 = scalar_lea.sflag [#allocation5], %s2560_s12 }
 0x412   : > { %p3338_p2 = pnand %p4345_p1, %p4344_p12 }
 0x414   : > { %3686 = dma.done.wait (!%p3338_p2), %s2561_s29, 384  }
 0x415   : > { %3688 = vsyncadd (!%p3338_p2), %s2561_s29, 4294966912  ;;  %s4346_s24 = smov %s3924_s13  ;;  %p25_p4 = scmp.ge.s32.totalorder %s3914_s22, 4  }
 0x416   : > { %s4347_s13 = smov %s3695_s14  ;;  %s4348_s14 = smov %s3699_s15 }
 0x417   : > { %s4349_s15 = smov %s4346_s24  ;;  %s4350_s16 = smov %s3914_s22 }
 0x418   :  { %27 = sbr.rel (!%p25_p4) target bundleno = 10 (0xa), region = 131 }
 0x41f   :  { %2566 = vsyncpa [#allocation4], 1 }
 0x420   :  { %2568 = vsyncpa [#allocation4 + $0x1], 1 }
 0x421   :  { %2569 = vsyncpa [#allocation7], 1 }
 0x422   :  { %2570 = vsyncpa [#allocation10], 1 }
 0x423   :  { %2571 = vsyncpa [#allocation5], 1 }
 0x424   :  { %2573 = vsyncpa [#allocation5 + $0x1], 1 }

</bundles_post_ra>
